<compile_context>
chip_gen: v7x
topology: tpu7x:2x2x1
jax: 0.10.0
libtpu: 0.0.40
codegen_flags: <defaults>
</compile_context>

<pallas_src>
import numpy as np
import jax
import jax.numpy as jnp
from jax import lax
from jax.experimental import pallas as pl
from jax.experimental.pallas import tpu as pltpu


# -----------------------------------------------------------------------------
# Deterministic synthetic "ConvThreshold" parameters.  The reference module only
# exposes (risk_threshold, kernel_name, kernel_kwargs); we reconstruct it as a
# normalized Gaussian density kernel followed by a strict '>' threshold.
# TODO(synk): confirm the reference ConvThreshold uses zero ('same') padding and
# strict '>' thresholding; replicate padding / '>=' would differ at borders.
RISK_THRESHOLD = 0.5
KERNEL_SIZE = 5
KERNEL_SIGMA = 1.5


def make_gaussian_taps_1d(k, sigma):
    ax = np.arange(k, dtype=np.float64) - (k - 1) / 2.0
    g = np.exp(-(ax ** 2) / (2.0 * sigma ** 2))
    g = g / g.sum()            # outer(g, g) == the normalized 2-D Gaussian exactly
    return [float(v) for v in g]


def _round_up(x, m):
    return (x + m - 1) // m * m


def _pick_batch_block(B, per_map_bytes, target_bytes=1 << 21, max_blk=8):
    """Largest divisor of B (<= max_blk) keeping one input block under ~2 MiB."""
    if per_map_bytes >= target_bytes:
        return 1
    best = 1
    for d in range(1, B + 1):
        if B % d == 0 and d <= max_blk and d * per_map_bytes <= target_bytes:
            best = d
    return best


def _make_fused_kernel(Hpad, Wp, H, W, Bblk, taps, thr):
    K = len(taps)
    p = K // 2
    Hs = Hpad + 2 * p                       # scratch rows (sublane halo)
    # If there are at least p zero-padded lane columns, the circular roll wraps
    # zeros in and the boundary lane masks are unnecessary (saves 4 selects/pass).
    need_lane_mask = (Wp - W) < p
    # Padded pixels can exceed the threshold; exclude them from the IoU counts.
    need_valid = (Wp > W) or (Hpad > H)

    def kernel(pred_ref, gt_ref, prmap_ref, grmap_ref, stats_ref, pad_ref):
        f32 = jnp.float32
        # Zero the sublane halo EVERY grid step: scratch persists across steps and,
        # under megacore 'parallel' semantics, each core must init its own copy.
        pad_ref[0:p, :] = jnp.zeros((p, Wp), f32)
        pad_ref[p + Hpad:Hs, :] = jnp.zeros((p, Wp), f32)

        # Boundary / validity masks hoisted once per step (JAX does not CSE
        # broadcast_in_dim — do not rebuild these inside the image loop).
        col = lax.broadcasted_iota(jnp.int32, (Hpad, Wp), 1)
        lane_valid = {}
        if need_lane_mask:
            for t in range(K):
                s = t - p
                if s != 0:
                    lane_valid[s] = (col < (Wp - s)) if s > 0 else (col >= (-s))
        if need_valid:
            row = lax.broadcasted_iota(jnp.int32, (Hpad, Wp), 0)
            orig_valid = jnp.logical_and(row < H, col < W)

        def conv_mask(x):
            # Row (lane) pass: neighbour columns come in through the XLU (roll),
            # leaving the VALU slots for the FMAs.
            tmp = taps[p] * x
            for t in range(K):
                s = t - p
                if s == 0:
                    continue
                # Static circular shift; for multi-vreg rows both small and
                # (Wp - s) amounts lower to the same lane-rotate + cross-vreg mix.
                shifted = pltpu.roll(x, shift=(-s) % Wp, axis=1)
                if need_lane_mask:
                    shifted = jnp.where(lane_valid[s], shifted, 0.0)
                tmp = tmp + taps[t] * shifted
            # Column (sublane) pass through the zero-haloed scratch.
            pad_ref[p:p + Hpad, :] = tmp
            acc = taps[p] * tmp
            for t in range(K):
                s = t - p
                if s == 0:
                    continue
                acc = acc + taps[t] * pad_ref[p + s:p + s + Hpad, :]
            # TODO(synk): on v7x, replace this sublane pass with a banded-matrix
            # jnp.dot on the otherwise-idle MXU once the kernel is VALU/vld bound.
            return acc, acc > thr

        lane4 = lax.broadcasted_iota(jnp.int32, (1, 4), 1)
        for bi in range(Bblk):              # static unroll over the batch block
            px = pred_ref[bi]               # (Hpad, Wp)
            gx = gt_ref[bi]

            p_map, p_mb = conv_mask(px)
            prmap_ref[bi] = p_map
            g_map, g_mb = conv_mask(gx)
            grmap_ref[bi] = g_map

            # Masked global-risk sums + IoU counts, consumed while still in VMEM
            # (the masks themselves never round-trip through HBM).
            i_mb = jnp.logical_and(p_mb, g_mb)
            u_mb = jnp.logical_or(p_mb, g_mb)
            if need_valid:
                i_mb = jnp.logical_and(i_mb, orig_valid)
                u_mb = jnp.logical_and(u_mb, orig_valid)
            psum = jnp.sum(jnp.where(p_mb, px, 0.0), keepdims=True)   # (1,1)
            gsum = jnp.sum(jnp.where(g_mb, gx, 0.0), keepdims=True)
            inter = jnp.sum(i_mb.astype(f32), keepdims=True)
            union = jnp.sum(u_mb.astype(f32), keepdims=True)
            # All four per-image scalars packed into one (1,4) store -> 1 out DMA.
            stats_ref[bi] = jnp.where(lane4 == 0, psum,
                            jnp.where(lane4 == 1, gsum,
                            jnp.where(lane4 == 2, inter, union)))

    return kernel


def density_cluster_fused(pred_bev, gt_bev, taps, risk_threshold):
    """Single pallas_call: risk maps for pred & gt plus, per batch element,
    [masked-risk-sum(pred), masked-risk-sum(gt), IoU intersection, IoU union]."""
    B, H, W = pred_bev.shape
    K = len(taps)
    p = K // 2
    thr = float(risk_threshold)

    # Pad W to a lane-dense multiple of 128 (unmasked vld/vst on every map DMA)
    # and H to a sublane multiple of 8.  Zero padding keeps the 'same'-conv result
    # on the original extent identical; padded pixels are excluded from the stats.
    Wp = _round_up(W, 128)
    Hpad = _round_up(H, 8)
    if (Wp, Hpad) != (W, H):
        pred_bev = jnp.pad(pred_bev, ((0, 0), (0, Hpad - H), (0, Wp - W)))
        gt_bev = jnp.pad(gt_bev, ((0, 0), (0, Hpad - H), (0, Wp - W)))

    per_map_bytes = Hpad * Wp * 4
    Bblk = _pick_batch_block(B, per_map_bytes)
    grid = (B // Bblk,)

    kernel = _make_fused_kernel(Hpad, Wp, H, W, Bblk, taps, thr)

    map_spec = pl.BlockSpec((Bblk, Hpad, Wp), lambda b: (b, 0, 0))
    stat_spec = pl.BlockSpec((Bblk, 1, 4), lambda b: (b, 0, 0))

    out_shape = (
        jax.ShapeDtypeStruct((B, Hpad, Wp), jnp.float32),   # pred risk_map
        jax.ShapeDtypeStruct((B, Hpad, Wp), jnp.float32),   # gt   risk_map
        jax.ShapeDtypeStruct((B, 1, 4), jnp.float32),       # [psum, gsum, inter, union]
    )

    # Explicit scoped-VMEM budget from the per-step footprint:
    # (2 inputs + 2 map outputs) double-buffered + the haloed scratch.
    block_bytes = Bblk * per_map_bytes
    footprint = 4 * 2 * block_bytes + (Hpad + 2 * p) * Wp * 4 + 2 * Bblk * 16
    vmem_limit = int(min(100 << 20, max(footprint * 5 // 4 + (1 << 20), 16 << 20)))
    # TODO(synk): on v7x (64 MiB VMEM) very large BEV maps should switch to H row
    # tiling with a 2*p halo (grid=(B, cdiv(H, TH)), both axes 'parallel') instead
    # of one full-image block per step.

    grid_spec = pltpu.PrefetchScalarGridSpec(
        num_scalar_prefetch=0,
        grid=grid,
        in_specs=[map_spec, map_spec],
        out_specs=[map_spec, map_spec, stat_spec],
        scratch_shapes=[pltpu.VMEM((Hpad + 2 * p, Wp), jnp.float32)],
    )
    p_map, g_map, stats = pl.pallas_call(
        kernel,
        out_shape=out_shape,
        grid_spec=grid_spec,
        compiler_params=pltpu.CompilerParams(
            dimension_semantics=("parallel",),
            vmem_limit_bytes=vmem_limit),
    )(pred_bev, gt_bev)

    p_map = p_map[:, :H, :W]
    g_map = g_map[:, :H, :W]
    # Risk masks are recomputed from the returned f32 maps (bit-identical to the
    # in-kernel thresholding) instead of being stored by the kernel — cuts the
    # kernel's map-output HBM traffic by a third and fuses with the un-pad slice.
    p_mask = (p_map > thr).astype(jnp.float32)
    g_mask = (g_map > thr).astype(jnp.float32)
    return (p_map, p_mask, g_map, g_mask,
            stats[:, 0, 0], stats[:, 0, 1], stats[:, 0, 2], stats[:, 0, 3])


class DensityClusterPallas:
    """JAX/Pallas re-implementation of DensityCluster.forward (metric path)."""

    def __init__(self, risk_threshold=RISK_THRESHOLD,
                 kernel_size=KERNEL_SIZE, sigma=KERNEL_SIGMA):
        self.risk_threshold = float(risk_threshold)
        self.taps = make_gaussian_taps_1d(kernel_size, sigma)

    def forward(self, pred, gt, dist_metric_result=None):
        pred_bev = pred["bev_map"][:, 0]          # (B, H, W)
        gt_bev = gt["bev_map"][:, 0]
        B, H, W = pred_bev.shape

        (p_rmap, p_rmask, g_rmap, g_rmask,
         p_sum, g_sum, inter, union) = density_cluster_fused(
            pred_bev, gt_bev, self.taps, self.risk_threshold)

        pred_area = W * H * pred["bev_scale"] * pred["bev_scale"]
        gt_area = W * H * gt["bev_scale"] * gt["bev_scale"]
        pred_global = p_sum / pred_area
        gt_global = g_sum / gt_area

        loss = jnp.mean((pred_global - gt_global) ** 2)       # nn.MSELoss default
        iou = jnp.where(union == 0, 1.0, inter / jnp.maximum(union, 1.0))

        # TODO(synk): BEVTransform (BEV->image-view homography) is not defined in
        # the reference source; risk_map_iv is omitted.
        # TODO(synk): NMSHead / get_individual_risks need the external NMS head;
        # only the dist_metric_result=None branch (empty per-sample lists) is kept.
        metric_result = dict(
            pred=dict(
                risk_map_bev=p_rmap[:, None, :, :],
                risk_mask_bev=p_rmask[:, None, :, :],
                global_risk=pred_global,
                area=pred_area,
                individual_risks=[[] for _ in range(B)],
            ),
            gt=dict(
                risk_map_bev=g_rmap[:, None, :, :],
                risk_mask_bev=g_rmask[:, None, :, :],
                global_risk=gt_global,
                area=gt_area,
                individual_risks=[[] for _ in range(B)],
            ),
        )
        metric_result["summary"] = dict(
            loss=dict(global_risk=loss),
            iou=np.asarray(iou),                   # host sync, mirrors .cpu().numpy()
        )
        for j in ("gt", "pred"):
            metric_result[j]["global_risk"] = np.asarray(
                metric_result[j]["global_risk"])   # host sync, mirrors reference
        return metric_result


# -----------------------------------------------------------------------------
# Pure-JAX reference + consistency checks (exercises both kernel branches).
def _reference_conv(x, taps):
    """Direct zero-padded 'same' 2-D conv with outer(taps, taps), pure VPU math."""
    K = len(taps)
    p = K // 2
    B, H, W = x.shape
    xp = jnp.pad(x, ((0, 0), (p, p), (p, p)))
    out = jnp.zeros_like(x)
    for dr in range(K):
        for dc in range(K):
            out = out + taps[dr] * taps[dc] * xp[:, dr:dr + H, dc:dc + W]
    return out


def _expect(cond, msg):
    if not bool(cond):
        raise AssertionError(msg)


def _check(pred_bev, gt_bev, taps, thr):
    (p_rmap, p_rmask, g_rmap, g_rmask,
     p_sum, g_sum, inter, union) = density_cluster_fused(pred_bev, gt_bev, taps, thr)
    ref_p = _reference_conv(pred_bev, taps)
    ref_g = _reference_conv(gt_bev, taps)
    _expect(jnp.allclose(p_rmap, ref_p, rtol=1e-5, atol=1e-5), "pred risk_map mismatch")
    _expect(jnp.allclose(g_rmap, ref_g, rtol=1e-5, atol=1e-5), "gt risk_map mismatch")

    # In-kernel reductions must be consistent with the returned maps (same f32
    # values thresholded, so no borderline-pixel flakiness).
    B = pred_bev.shape[0]
    pm = p_rmap > thr
    gm = g_rmap > thr
    _expect(jnp.all(p_rmask == pm.astype(jnp.float32)), "pred mask mismatch")
    _expect(jnp.all(g_rmask == gm.astype(jnp.float32)), "gt mask mismatch")
    ref_psum = jnp.sum(jnp.where(pm, pred_bev, 0.0).reshape(B, -1), -1)
    ref_gsum = jnp.sum(jnp.where(gm, gt_bev, 0.0).reshape(B, -1), -1)
    ref_inter = jnp.sum(jnp.logical_and(pm, gm).reshape(B, -1).astype(jnp.float32), -1)
    ref_union = jnp.sum(jnp.logical_or(pm, gm).reshape(B, -1).astype(jnp.float32), -1)
    _expect(jnp.allclose(p_sum, ref_psum, rtol=1e-4, atol=1e-4), "pred masked-sum mismatch")
    _expect(jnp.allclose(g_sum, ref_gsum, rtol=1e-4, atol=1e-4), "gt masked-sum mismatch")
    _expect(jnp.allclose(inter, ref_inter, atol=0.5), "IoU intersection mismatch")
    _expect(jnp.allclose(union, ref_union, atol=0.5), "IoU union mismatch")


if __name__ == "__main__":
    key = jax.random.PRNGKey(0)
    module = DensityClusterPallas()

    # Case A: small unaligned map -> exercises the pad/slice + no-lane-mask path.
    B, C, H, W = 2, 1, 16, 16
    k1, k2, k3, k4 = jax.random.split(key, 4)
    pred_map = jax.random.uniform(k1, (B, C, H, W), jnp.float32)
    gt_map = jax.random.uniform(k2, (B, C, H, W), jnp.float32)
    _check(pred_map[:, 0], gt_map[:, 0], module.taps, module.risk_threshold)

    # Case B: lane-aligned width (no padding) -> exercises the boundary-mask path.
    pb = jax.random.uniform(k3, (B, 8, 128), jnp.float32)
    gb = jax.random.uniform(k4, (B, 8, 128), jnp.float32)
    _check(pb, gb, module.taps, module.risk_threshold)

    # Full module forward (dict plumbing, loss, IoU summary).
    bev_scale = jnp.full((B,), 0.25, jnp.float32)
    cam = dict(
        camera_height=jnp.full((B,), 3.0, jnp.float32),
        camera_angle=jnp.full((B,), 0.3, jnp.float32),
        camera_fu=jnp.full((B,), 500.0, jnp.float32),
        camera_fv=jnp.full((B,), 500.0, jnp.float32),
    )
    pred = dict(bev_map=pred_map, bev_scale=bev_scale, **cam)
    gt = dict(bev_map=gt_map, bev_scale=bev_scale, **cam)
    result = module.forward(pred, gt)

    jax.block_until_ready(result["pred"]["risk_map_bev"])
    jax.block_until_ready(result["gt"]["risk_mask_bev"])
    jax.block_until_ready(result["summary"]["loss"]["global_risk"])
    print("KERNEL_OK")
</pallas_src>

<mosaic_0001>
module attributes {stable_mosaic.version = 11 : i64} {
  func.func @kernel(%arg0: i32, %arg1: memref<2x16x128xf32, #tpu.memory_space<vmem>>, %arg2: memref<2x16x128xf32, #tpu.memory_space<vmem>>, %arg3: memref<2x16x128xf32, #tpu.memory_space<vmem>>, %arg4: memref<2x16x128xf32, #tpu.memory_space<vmem>>, %arg5: memref<2x1x4xf32, #tpu.memory_space<vmem>>, %arg6: memref<20x128xf32, #tpu.memory_space<vmem>>) attributes {dimension_semantics = [#tpu.dimension_semantics<parallel>], iteration_bounds = array<i64: 1>, scalar_prefetch = 0 : i64, scratch_operands = 1 : i64, tpu.core_type = #tpu.core_type<tc>, window_params = [{transform_indices = @transform_0, window_bounds = array<i64: 2, 16, 128>}, {transform_indices = @transform_1, window_bounds = array<i64: 2, 16, 128>}, {transform_indices = @transform_2, window_bounds = array<i64: 2, 16, 128>}, {transform_indices = @transform_3, window_bounds = array<i64: 2, 16, 128>}, {transform_indices = @transform_4, window_bounds = array<i64: 2, 1, 4>}]} {
    %cst = arith.constant 0.000000e+00 : f32
    %0 = vector.broadcast %cst : f32 to vector<2x128xf32>
    %c0 = arith.constant 0 : index
    %c0_0 = arith.constant 0 : index
    %1 = vector.load %arg6[%c0, %c0_0] : memref<20x128xf32, #tpu.memory_space<vmem>>, vector<2x128xf32>
    tpu.vector_store %arg6[%c0, %c0_0], %0 {strides = array<i32>} : memref<20x128xf32, #tpu.memory_space<vmem>>, vector<2x128xf32>,
    %cst_1 = arith.constant 0.000000e+00 : f32
    %2 = vector.broadcast %cst_1 : f32 to vector<2x128xf32>
    %c18 = arith.constant 18 : index
    %c0_2 = arith.constant 0 : index
    %3 = vector.load %arg6[%c18, %c0_2] : memref<20x128xf32, #tpu.memory_space<vmem>>, vector<2x128xf32>
    tpu.vector_store %arg6[%c18, %c0_2], %2 {strides = array<i32>} : memref<20x128xf32, #tpu.memory_space<vmem>>, vector<2x128xf32>,
    %4 = tpu.iota {dimensions = array<i32: 1>} : vector<16x128xi32>
    %5 = tpu.iota {dimensions = array<i32: 0>} : vector<16x128xi32>
    %c16_i32 = arith.constant 16 : i32
    %6 = vector.broadcast %c16_i32 : i32 to vector<16x128xi32>
    %7 = arith.cmpi slt, %5, %6 : vector<16x128xi32>
    %c16_i32_3 = arith.constant 16 : i32
    %8 = vector.broadcast %c16_i32_3 : i32 to vector<16x128xi32>
    %9 = arith.cmpi slt, %4, %8 : vector<16x128xi32>
    %10 = arith.andi %7, %9 : vector<16x128xi1>
    %11 = tpu.iota {dimensions = array<i32: 1>} : vector<1x4xi32>
    %c0_4 = arith.constant 0 : index
    %c0_5 = arith.constant 0 : index
    %c0_6 = arith.constant 0 : index
    %12 = vector.load %arg1[%c0_4, %c0_5, %c0_6] : memref<2x16x128xf32, #tpu.memory_space<vmem>>, vector<1x16x128xf32>
    %13 = vector.shape_cast %12 : vector<1x16x128xf32> to vector<16x128xf32>
    %c0_7 = arith.constant 0 : index
    %c0_8 = arith.constant 0 : index
    %c0_9 = arith.constant 0 : index
    %14 = vector.load %arg2[%c0_7, %c0_8, %c0_9] : memref<2x16x128xf32, #tpu.memory_space<vmem>>, vector<1x16x128xf32>
    %15 = vector.shape_cast %14 : vector<1x16x128xf32> to vector<16x128xf32>
    %cst_10 = arith.constant 0.292081714 : f32
    %16 = vector.broadcast %cst_10 : f32 to vector<16x128xf32>
    %17 = arith.mulf %16, %13 : vector<16x128xf32>
    %c2_i32 = arith.constant 2 : i32
    %18 = tpu.dynamic_rotate %13 by %c2_i32 dim 1 : vector<16x128xf32>, i32 -> vector<16x128xf32>
    %cst_11 = arith.constant 0.120078385 : f32
    %19 = vector.broadcast %cst_11 : f32 to vector<16x128xf32>
    %20 = arith.mulf %19, %18 : vector<16x128xf32>
    %21 = arith.addf %17, %20 : vector<16x128xf32>
    %c1_i32 = arith.constant 1 : i32
    %22 = tpu.dynamic_rotate %13 by %c1_i32 dim 1 : vector<16x128xf32>, i32 -> vector<16x128xf32>
    %cst_12 = arith.constant 0.233880758 : f32
    %23 = vector.broadcast %cst_12 : f32 to vector<16x128xf32>
    %24 = arith.mulf %23, %22 : vector<16x128xf32>
    %25 = arith.addf %21, %24 : vector<16x128xf32>
    %c127_i32 = arith.constant 127 : i32
    %26 = tpu.dynamic_rotate %13 by %c127_i32 dim 1 : vector<16x128xf32>, i32 -> vector<16x128xf32>
    %cst_13 = arith.constant 0.233880758 : f32
    %27 = vector.broadcast %cst_13 : f32 to vector<16x128xf32>
    %28 = arith.mulf %27, %26 : vector<16x128xf32>
    %29 = arith.addf %25, %28 : vector<16x128xf32>
    %c126_i32 = arith.constant 126 : i32
    %30 = tpu.dynamic_rotate %13 by %c126_i32 dim 1 : vector<16x128xf32>, i32 -> vector<16x128xf32>
    %cst_14 = arith.constant 0.120078385 : f32
    %31 = vector.broadcast %cst_14 : f32 to vector<16x128xf32>
    %32 = arith.mulf %31, %30 : vector<16x128xf32>
    %33 = arith.addf %29, %32 : vector<16x128xf32>
    %c2 = arith.constant 2 : index
    %c0_15 = arith.constant 0 : index
    %34 = vector.load %arg6[%c2, %c0_15] : memref<20x128xf32, #tpu.memory_space<vmem>>, vector<16x128xf32>
    tpu.vector_store %arg6[%c2, %c0_15], %33 {strides = array<i32>} : memref<20x128xf32, #tpu.memory_space<vmem>>, vector<16x128xf32>,
    %cst_16 = arith.constant 0.292081714 : f32
    %35 = vector.broadcast %cst_16 : f32 to vector<16x128xf32>
    %36 = arith.mulf %35, %33 : vector<16x128xf32>
    %c0_17 = arith.constant 0 : index
    %c0_18 = arith.constant 0 : index
    %37 = vector.load %arg6[%c0_17, %c0_18] : memref<20x128xf32, #tpu.memory_space<vmem>>, vector<16x128xf32>
    %cst_19 = arith.constant 0.120078385 : f32
    %38 = vector.broadcast %cst_19 : f32 to vector<16x128xf32>
    %39 = arith.mulf %38, %37 : vector<16x128xf32>
    %40 = arith.addf %36, %39 : vector<16x128xf32>
    %c1 = arith.constant 1 : index
    %c0_20 = arith.constant 0 : index
    %41 = vector.load %arg6[%c1, %c0_20] : memref<20x128xf32, #tpu.memory_space<vmem>>, vector<16x128xf32>
    %cst_21 = arith.constant 0.233880758 : f32
    %42 = vector.broadcast %cst_21 : f32 to vector<16x128xf32>
    %43 = arith.mulf %42, %41 : vector<16x128xf32>
    %44 = arith.addf %40, %43 : vector<16x128xf32>
    %c3 = arith.constant 3 : index
    %c0_22 = arith.constant 0 : index
    %45 = vector.load %arg6[%c3, %c0_22] : memref<20x128xf32, #tpu.memory_space<vmem>>, vector<16x128xf32>
    %cst_23 = arith.constant 0.233880758 : f32
    %46 = vector.broadcast %cst_23 : f32 to vector<16x128xf32>
    %47 = arith.mulf %46, %45 : vector<16x128xf32>
    %48 = arith.addf %44, %47 : vector<16x128xf32>
    %c4 = arith.constant 4 : index
    %c0_24 = arith.constant 0 : index
    %49 = vector.load %arg6[%c4, %c0_24] : memref<20x128xf32, #tpu.memory_space<vmem>>, vector<16x128xf32>
    %cst_25 = arith.constant 0.120078385 : f32
    %50 = vector.broadcast %cst_25 : f32 to vector<16x128xf32>
    %51 = arith.mulf %50, %49 : vector<16x128xf32>
    %52 = arith.addf %48, %51 : vector<16x128xf32>
    %cst_26 = arith.constant 5.000000e-01 : f32
    %53 = vector.broadcast %cst_26 : f32 to vector<16x128xf32>
    %54 = arith.cmpf ogt, %52, %53 : vector<16x128xf32>
    %c0_27 = arith.constant 0 : index
    %c0_28 = arith.constant 0 : index
    %c0_29 = arith.constant 0 : index
    %55 = vector.load %arg3[%c0_27, %c0_28, %c0_29] : memref<2x16x128xf32, #tpu.memory_space<vmem>>, vector<1x16x128xf32>
    %56 = vector.shape_cast %55 : vector<1x16x128xf32> to vector<16x128xf32>
    %57 = vector.shape_cast %52 : vector<16x128xf32> to vector<1x16x128xf32>
    tpu.vector_store %arg3[%c0_27, %c0_28, %c0_29], %57 {strides = array<i32>} : memref<2x16x128xf32, #tpu.memory_space<vmem>>, vector<1x16x128xf32>,
    %cst_30 = arith.constant 0.292081714 : f32
    %58 = vector.broadcast %cst_30 : f32 to vector<16x128xf32>
    %59 = arith.mulf %58, %15 : vector<16x128xf32>
    %c2_i32_31 = arith.constant 2 : i32
    %60 = tpu.dynamic_rotate %15 by %c2_i32_31 dim 1 : vector<16x128xf32>, i32 -> vector<16x128xf32>
    %cst_32 = arith.constant 0.120078385 : f32
    %61 = vector.broadcast %cst_32 : f32 to vector<16x128xf32>
    %62 = arith.mulf %61, %60 : vector<16x128xf32>
    %63 = arith.addf %59, %62 : vector<16x128xf32>
    %c1_i32_33 = arith.constant 1 : i32
    %64 = tpu.dynamic_rotate %15 by %c1_i32_33 dim 1 : vector<16x128xf32>, i32 -> vector<16x128xf32>
    %cst_34 = arith.constant 0.233880758 : f32
    %65 = vector.broadcast %cst_34 : f32 to vector<16x128xf32>
    %66 = arith.mulf %65, %64 : vector<16x128xf32>
    %67 = arith.addf %63, %66 : vector<16x128xf32>
    %c127_i32_35 = arith.constant 127 : i32
    %68 = tpu.dynamic_rotate %15 by %c127_i32_35 dim 1 : vector<16x128xf32>, i32 -> vector<16x128xf32>
    %cst_36 = arith.constant 0.233880758 : f32
    %69 = vector.broadcast %cst_36 : f32 to vector<16x128xf32>
    %70 = arith.mulf %69, %68 : vector<16x128xf32>
    %71 = arith.addf %67, %70 : vector<16x128xf32>
    %c126_i32_37 = arith.constant 126 : i32
    %72 = tpu.dynamic_rotate %15 by %c126_i32_37 dim 1 : vector<16x128xf32>, i32 -> vector<16x128xf32>
    %cst_38 = arith.constant 0.120078385 : f32
    %73 = vector.broadcast %cst_38 : f32 to vector<16x128xf32>
    %74 = arith.mulf %73, %72 : vector<16x128xf32>
    %75 = arith.addf %71, %74 : vector<16x128xf32>
    %c2_39 = arith.constant 2 : index
    %c0_40 = arith.constant 0 : index
    %76 = vector.load %arg6[%c2_39, %c0_40] : memref<20x128xf32, #tpu.memory_space<vmem>>, vector<16x128xf32>
    tpu.vector_store %arg6[%c2_39, %c0_40], %75 {strides = array<i32>} : memref<20x128xf32, #tpu.memory_space<vmem>>, vector<16x128xf32>,
    %cst_41 = arith.constant 0.292081714 : f32
    %77 = vector.broadcast %cst_41 : f32 to vector<16x128xf32>
    %78 = arith.mulf %77, %75 : vector<16x128xf32>
    %c0_42 = arith.constant 0 : index
    %c0_43 = arith.constant 0 : index
    %79 = vector.load %arg6[%c0_42, %c0_43] : memref<20x128xf32, #tpu.memory_space<vmem>>, vector<16x128xf32>
    %cst_44 = arith.constant 0.120078385 : f32
    %80 = vector.broadcast %cst_44 : f32 to vector<16x128xf32>
    %81 = arith.mulf %80, %79 : vector<16x128xf32>
    %82 = arith.addf %78, %81 : vector<16x128xf32>
    %c1_45 = arith.constant 1 : index
    %c0_46 = arith.constant 0 : index
    %83 = vector.load %arg6[%c1_45, %c0_46] : memref<20x128xf32, #tpu.memory_space<vmem>>, vector<16x128xf32>
    %cst_47 = arith.constant 0.233880758 : f32
    %84 = vector.broadcast %cst_47 : f32 to vector<16x128xf32>
    %85 = arith.mulf %84, %83 : vector<16x128xf32>
    %86 = arith.addf %82, %85 : vector<16x128xf32>
    %c3_48 = arith.constant 3 : index
    %c0_49 = arith.constant 0 : index
    %87 = vector.load %arg6[%c3_48, %c0_49] : memref<20x128xf32, #tpu.memory_space<vmem>>, vector<16x128xf32>
    %cst_50 = arith.constant 0.233880758 : f32
    %88 = vector.broadcast %cst_50 : f32 to vector<16x128xf32>
    %89 = arith.mulf %88, %87 : vector<16x128xf32>
    %90 = arith.addf %86, %89 : vector<16x128xf32>
    %c4_51 = arith.constant 4 : index
    %c0_52 = arith.constant 0 : index
    %91 = vector.load %arg6[%c4_51, %c0_52] : memref<20x128xf32, #tpu.memory_space<vmem>>, vector<16x128xf32>
    %cst_53 = arith.constant 0.120078385 : f32
    %92 = vector.broadcast %cst_53 : f32 to vector<16x128xf32>
    %93 = arith.mulf %92, %91 : vector<16x128xf32>
    %94 = arith.addf %90, %93 : vector<16x128xf32>
    %cst_54 = arith.constant 5.000000e-01 : f32
    %95 = vector.broadcast %cst_54 : f32 to vector<16x128xf32>
    %96 = arith.cmpf ogt, %94, %95 : vector<16x128xf32>
    %c0_55 = arith.constant 0 : index
    %c0_56 = arith.constant 0 : index
    %c0_57 = arith.constant 0 : index
    %97 = vector.load %arg4[%c0_55, %c0_56, %c0_57] : memref<2x16x128xf32, #tpu.memory_space<vmem>>, vector<1x16x128xf32>
    %98 = vector.shape_cast %97 : vector<1x16x128xf32> to vector<16x128xf32>
    %99 = vector.shape_cast %94 : vector<16x128xf32> to vector<1x16x128xf32>
    tpu.vector_store %arg4[%c0_55, %c0_56, %c0_57], %99 {strides = array<i32>} : memref<2x16x128xf32, #tpu.memory_space<vmem>>, vector<1x16x128xf32>,
    %100 = arith.andi %54, %96 : vector<16x128xi1>
    %101 = arith.ori %54, %96 : vector<16x128xi1>
    %102 = arith.andi %100, %10 : vector<16x128xi1>
    %103 = arith.andi %101, %10 : vector<16x128xi1>
    %cst_58 = arith.constant 0.000000e+00 : f32
    %104 = vector.broadcast %cst_58 : f32 to vector<16x128xf32>
    %105 = arith.select %54, %13, %104 : vector<16x128xi1>, vector<16x128xf32>
    %106 = vector.shape_cast %105 : vector<16x128xf32> to vector<1x16x128xf32>
    %cst_59 = arith.constant dense<0.000000e+00> : vector<1xf32>
    %107 = vector.multi_reduction <add>, %106, %cst_59 [1, 2] : vector<1x16x128xf32> to vector<1xf32>
    %108 = vector.shape_cast %107 : vector<1xf32> to vector<1x1x1xf32>
    %109 = vector.extract %108[0, 0, 0] : f32 from vector<1x1x1xf32>
    %110 = vector.broadcast %109 : f32 to vector<1x1xf32>
    %cst_60 = arith.constant 0.000000e+00 : f32
    %111 = vector.broadcast %cst_60 : f32 to vector<16x128xf32>
    %112 = arith.select %96, %15, %111 : vector<16x128xi1>, vector<16x128xf32>
    %113 = vector.shape_cast %112 : vector<16x128xf32> to vector<1x16x128xf32>
    %cst_61 = arith.constant dense<0.000000e+00> : vector<1xf32>
    %114 = vector.multi_reduction <add>, %113, %cst_61 [1, 2] : vector<1x16x128xf32> to vector<1xf32>
    %115 = vector.shape_cast %114 : vector<1xf32> to vector<1x1x1xf32>
    %116 = vector.extract %115[0, 0, 0] : f32 from vector<1x1x1xf32>
    %117 = vector.broadcast %116 : f32 to vector<1x1xf32>
    %118 = arith.extui %102 : vector<16x128xi1> to vector<16x128xi32>
    %119 = arith.sitofp %118 : vector<16x128xi32> to vector<16x128xf32>
    %120 = vector.shape_cast %119 : vector<16x128xf32> to vector<1x16x128xf32>
    %cst_62 = arith.constant dense<0.000000e+00> : vector<1xf32>
    %121 = vector.multi_reduction <add>, %120, %cst_62 [1, 2] : vector<1x16x128xf32> to vector<1xf32>
    %122 = vector.shape_cast %121 : vector<1xf32> to vector<1x1x1xf32>
    %123 = vector.extract %122[0, 0, 0] : f32 from vector<1x1x1xf32>
    %124 = vector.broadcast %123 : f32 to vector<1x1xf32>
    %125 = arith.extui %103 : vector<16x128xi1> to vector<16x128xi32>
    %126 = arith.sitofp %125 : vector<16x128xi32> to vector<16x128xf32>
    %127 = vector.shape_cast %126 : vector<16x128xf32> to vector<1x16x128xf32>
    %cst_63 = arith.constant dense<0.000000e+00> : vector<1xf32>
    %128 = vector.multi_reduction <add>, %127, %cst_63 [1, 2] : vector<1x16x128xf32> to vector<1xf32>
    %129 = vector.shape_cast %128 : vector<1xf32> to vector<1x1x1xf32>
    %130 = vector.extract %129[0, 0, 0] : f32 from vector<1x1x1xf32>
    %131 = vector.broadcast %130 : f32 to vector<1x1xf32>
    %c0_i32 = arith.constant 0 : i32
    %132 = vector.broadcast %c0_i32 : i32 to vector<1x4xi32>
    %133 = arith.cmpi eq, %11, %132 : vector<1x4xi32>
    %c1_i32_64 = arith.constant 1 : i32
    %134 = vector.broadcast %c1_i32_64 : i32 to vector<1x4xi32>
    %135 = arith.cmpi eq, %11, %134 : vector<1x4xi32>
    %c2_i32_65 = arith.constant 2 : i32
    %136 = vector.broadcast %c2_i32_65 : i32 to vector<1x4xi32>
    %137 = arith.cmpi eq, %11, %136 : vector<1x4xi32>
    %138 = vector.shape_cast %124 : vector<1x1xf32> to vector<1x1xf32>
    %139 = vector.broadcast %138 : vector<1x1xf32> to vector<1x4xf32>
    %140 = vector.shape_cast %131 : vector<1x1xf32> to vector<1x1xf32>
    %141 = vector.broadcast %140 : vector<1x1xf32> to vector<1x4xf32>
    %142 = arith.select %137, %139, %141 : vector<1x4xi1>, vector<1x4xf32>
    %143 = vector.shape_cast %117 : vector<1x1xf32> to vector<1x1xf32>
    %144 = vector.broadcast %143 : vector<1x1xf32> to vector<1x4xf32>
    %145 = arith.select %135, %144, %142 : vector<1x4xi1>, vector<1x4xf32>
    %146 = vector.shape_cast %110 : vector<1x1xf32> to vector<1x1xf32>
    %147 = vector.broadcast %146 : vector<1x1xf32> to vector<1x4xf32>
    %148 = arith.select %133, %147, %145 : vector<1x4xi1>, vector<1x4xf32>
    %c0_66 = arith.constant 0 : index
    %c0_67 = arith.constant 0 : index
    %c0_68 = arith.constant 0 : index
    %149 = vector.load %arg5[%c0_66, %c0_67, %c0_68] : memref<2x1x4xf32, #tpu.memory_space<vmem>>, vector<1x1x4xf32>
    %150 = vector.shape_cast %149 : vector<1x1x4xf32> to vector<1x4xf32>
    %151 = vector.shape_cast %148 : vector<1x4xf32> to vector<1x1x4xf32>
    tpu.vector_store %arg5[%c0_66, %c0_67, %c0_68], %151 {strides = array<i32>} : memref<2x1x4xf32, #tpu.memory_space<vmem>>, vector<1x1x4xf32>,
    %c1_69 = arith.constant 1 : index
    %c0_70 = arith.constant 0 : index
    %c0_71 = arith.constant 0 : index
    %152 = vector.load %arg1[%c1_69, %c0_70, %c0_71] : memref<2x16x128xf32, #tpu.memory_space<vmem>>, vector<1x16x128xf32>
    %153 = vector.shape_cast %152 : vector<1x16x128xf32> to vector<16x128xf32>
    %c1_72 = arith.constant 1 : index
    %c0_73 = arith.constant 0 : index
    %c0_74 = arith.constant 0 : index
    %154 = vector.load %arg2[%c1_72, %c0_73, %c0_74] : memref<2x16x128xf32, #tpu.memory_space<vmem>>, vector<1x16x128xf32>
    %155 = vector.shape_cast %154 : vector<1x16x128xf32> to vector<16x128xf32>
    %cst_75 = arith.constant 0.292081714 : f32
    %156 = vector.broadcast %cst_75 : f32 to vector<16x128xf32>
    %157 = arith.mulf %156, %153 : vector<16x128xf32>
    %c2_i32_76 = arith.constant 2 : i32
    %158 = tpu.dynamic_rotate %153 by %c2_i32_76 dim 1 : vector<16x128xf32>, i32 -> vector<16x128xf32>
    %cst_77 = arith.constant 0.120078385 : f32
    %159 = vector.broadcast %cst_77 : f32 to vector<16x128xf32>
    %160 = arith.mulf %159, %158 : vector<16x128xf32>
    %161 = arith.addf %157, %160 : vector<16x128xf32>
    %c1_i32_78 = arith.constant 1 : i32
    %162 = tpu.dynamic_rotate %153 by %c1_i32_78 dim 1 : vector<16x128xf32>, i32 -> vector<16x128xf32>
    %cst_79 = arith.constant 0.233880758 : f32
    %163 = vector.broadcast %cst_79 : f32 to vector<16x128xf32>
    %164 = arith.mulf %163, %162 : vector<16x128xf32>
    %165 = arith.addf %161, %164 : vector<16x128xf32>
    %c127_i32_80 = arith.constant 127 : i32
    %166 = tpu.dynamic_rotate %153 by %c127_i32_80 dim 1 : vector<16x128xf32>, i32 -> vector<16x128xf32>
    %cst_81 = arith.constant 0.233880758 : f32
    %167 = vector.broadcast %cst_81 : f32 to vector<16x128xf32>
    %168 = arith.mulf %167, %166 : vector<16x128xf32>
    %169 = arith.addf %165, %168 : vector<16x128xf32>
    %c126_i32_82 = arith.constant 126 : i32
    %170 = tpu.dynamic_rotate %153 by %c126_i32_82 dim 1 : vector<16x128xf32>, i32 -> vector<16x128xf32>
    %cst_83 = arith.constant 0.120078385 : f32
    %171 = vector.broadcast %cst_83 : f32 to vector<16x128xf32>
    %172 = arith.mulf %171, %170 : vector<16x128xf32>
    %173 = arith.addf %169, %172 : vector<16x128xf32>
    %c2_84 = arith.constant 2 : index
    %c0_85 = arith.constant 0 : index
    %174 = vector.load %arg6[%c2_84, %c0_85] : memref<20x128xf32, #tpu.memory_space<vmem>>, vector<16x128xf32>
    tpu.vector_store %arg6[%c2_84, %c0_85], %173 {strides = array<i32>} : memref<20x128xf32, #tpu.memory_space<vmem>>, vector<16x128xf32>,
    %cst_86 = arith.constant 0.292081714 : f32
    %175 = vector.broadcast %cst_86 : f32 to vector<16x128xf32>
    %176 = arith.mulf %175, %173 : vector<16x128xf32>
    %c0_87 = arith.constant 0 : index
    %c0_88 = arith.constant 0 : index
    %177 = vector.load %arg6[%c0_87, %c0_88] : memref<20x128xf32, #tpu.memory_space<vmem>>, vector<16x128xf32>
    %cst_89 = arith.constant 0.120078385 : f32
    %178 = vector.broadcast %cst_89 : f32 to vector<16x128xf32>
    %179 = arith.mulf %178, %177 : vector<16x128xf32>
    %180 = arith.addf %176, %179 : vector<16x128xf32>
    %c1_90 = arith.constant 1 : index
    %c0_91 = arith.constant 0 : index
    %181 = vector.load %arg6[%c1_90, %c0_91] : memref<20x128xf32, #tpu.memory_space<vmem>>, vector<16x128xf32>
    %cst_92 = arith.constant 0.233880758 : f32
    %182 = vector.broadcast %cst_92 : f32 to vector<16x128xf32>
    %183 = arith.mulf %182, %181 : vector<16x128xf32>
    %184 = arith.addf %180, %183 : vector<16x128xf32>
    %c3_93 = arith.constant 3 : index
    %c0_94 = arith.constant 0 : index
    %185 = vector.load %arg6[%c3_93, %c0_94] : memref<20x128xf32, #tpu.memory_space<vmem>>, vector<16x128xf32>
    %cst_95 = arith.constant 0.233880758 : f32
    %186 = vector.broadcast %cst_95 : f32 to vector<16x128xf32>
    %187 = arith.mulf %186, %185 : vector<16x128xf32>
    %188 = arith.addf %184, %187 : vector<16x128xf32>
    %c4_96 = arith.constant 4 : index
    %c0_97 = arith.constant 0 : index
    %189 = vector.load %arg6[%c4_96, %c0_97] : memref<20x128xf32, #tpu.memory_space<vmem>>, vector<16x128xf32>
    %cst_98 = arith.constant 0.120078385 : f32
    %190 = vector.broadcast %cst_98 : f32 to vector<16x128xf32>
    %191 = arith.mulf %190, %189 : vector<16x128xf32>
    %192 = arith.addf %188, %191 : vector<16x128xf32>
    %cst_99 = arith.constant 5.000000e-01 : f32
    %193 = vector.broadcast %cst_99 : f32 to vector<16x128xf32>
    %194 = arith.cmpf ogt, %192, %193 : vector<16x128xf32>
    %c1_100 = arith.constant 1 : index
    %c0_101 = arith.constant 0 : index
    %c0_102 = arith.constant 0 : index
    %195 = vector.load %arg3[%c1_100, %c0_101, %c0_102] : memref<2x16x128xf32, #tpu.memory_space<vmem>>, vector<1x16x128xf32>
    %196 = vector.shape_cast %195 : vector<1x16x128xf32> to vector<16x128xf32>
    %197 = vector.shape_cast %192 : vector<16x128xf32> to vector<1x16x128xf32>
    tpu.vector_store %arg3[%c1_100, %c0_101, %c0_102], %197 {strides = array<i32>} : memref<2x16x128xf32, #tpu.memory_space<vmem>>, vector<1x16x128xf32>,
    %cst_103 = arith.constant 0.292081714 : f32
    %198 = vector.broadcast %cst_103 : f32 to vector<16x128xf32>
    %199 = arith.mulf %198, %155 : vector<16x128xf32>
    %c2_i32_104 = arith.constant 2 : i32
    %200 = tpu.dynamic_rotate %155 by %c2_i32_104 dim 1 : vector<16x128xf32>, i32 -> vector<16x128xf32>
    %cst_105 = arith.constant 0.120078385 : f32
    %201 = vector.broadcast %cst_105 : f32 to vector<16x128xf32>
    %202 = arith.mulf %201, %200 : vector<16x128xf32>
    %203 = arith.addf %199, %202 : vector<16x128xf32>
    %c1_i32_106 = arith.constant 1 : i32
    %204 = tpu.dynamic_rotate %155 by %c1_i32_106 dim 1 : vector<16x128xf32>, i32 -> vector<16x128xf32>
    %cst_107 = arith.constant 0.233880758 : f32
    %205 = vector.broadcast %cst_107 : f32 to vector<16x128xf32>
    %206 = arith.mulf %205, %204 : vector<16x128xf32>
    %207 = arith.addf %203, %206 : vector<16x128xf32>
    %c127_i32_108 = arith.constant 127 : i32
    %208 = tpu.dynamic_rotate %155 by %c127_i32_108 dim 1 : vector<16x128xf32>, i32 -> vector<16x128xf32>
    %cst_109 = arith.constant 0.233880758 : f32
    %209 = vector.broadcast %cst_109 : f32 to vector<16x128xf32>
    %210 = arith.mulf %209, %208 : vector<16x128xf32>
    %211 = arith.addf %207, %210 : vector<16x128xf32>
    %c126_i32_110 = arith.constant 126 : i32
    %212 = tpu.dynamic_rotate %155 by %c126_i32_110 dim 1 : vector<16x128xf32>, i32 -> vector<16x128xf32>
    %cst_111 = arith.constant 0.120078385 : f32
    %213 = vector.broadcast %cst_111 : f32 to vector<16x128xf32>
    %214 = arith.mulf %213, %212 : vector<16x128xf32>
    %215 = arith.addf %211, %214 : vector<16x128xf32>
    %c2_112 = arith.constant 2 : index
    %c0_113 = arith.constant 0 : index
    %216 = vector.load %arg6[%c2_112, %c0_113] : memref<20x128xf32, #tpu.memory_space<vmem>>, vector<16x128xf32>
    tpu.vector_store %arg6[%c2_112, %c0_113], %215 {strides = array<i32>} : memref<20x128xf32, #tpu.memory_space<vmem>>, vector<16x128xf32>,
    %cst_114 = arith.constant 0.292081714 : f32
    %217 = vector.broadcast %cst_114 : f32 to vector<16x128xf32>
    %218 = arith.mulf %217, %215 : vector<16x128xf32>
    %c0_115 = arith.constant 0 : index
    %c0_116 = arith.constant 0 : index
    %219 = vector.load %arg6[%c0_115, %c0_116] : memref<20x128xf32, #tpu.memory_space<vmem>>, vector<16x128xf32>
    %cst_117 = arith.constant 0.120078385 : f32
    %220 = vector.broadcast %cst_117 : f32 to vector<16x128xf32>
    %221 = arith.mulf %220, %219 : vector<16x128xf32>
    %222 = arith.addf %218, %221 : vector<16x128xf32>
    %c1_118 = arith.constant 1 : index
    %c0_119 = arith.constant 0 : index
    %223 = vector.load %arg6[%c1_118, %c0_119] : memref<20x128xf32, #tpu.memory_space<vmem>>, vector<16x128xf32>
    %cst_120 = arith.constant 0.233880758 : f32
    %224 = vector.broadcast %cst_120 : f32 to vector<16x128xf32>
    %225 = arith.mulf %224, %223 : vector<16x128xf32>
    %226 = arith.addf %222, %225 : vector<16x128xf32>
    %c3_121 = arith.constant 3 : index
    %c0_122 = arith.constant 0 : index
    %227 = vector.load %arg6[%c3_121, %c0_122] : memref<20x128xf32, #tpu.memory_space<vmem>>, vector<16x128xf32>
    %cst_123 = arith.constant 0.233880758 : f32
    %228 = vector.broadcast %cst_123 : f32 to vector<16x128xf32>
    %229 = arith.mulf %228, %227 : vector<16x128xf32>
    %230 = arith.addf %226, %229 : vector<16x128xf32>
    %c4_124 = arith.constant 4 : index
    %c0_125 = arith.constant 0 : index
    %231 = vector.load %arg6[%c4_124, %c0_125] : memref<20x128xf32, #tpu.memory_space<vmem>>, vector<16x128xf32>
    %cst_126 = arith.constant 0.120078385 : f32
    %232 = vector.broadcast %cst_126 : f32 to vector<16x128xf32>
    %233 = arith.mulf %232, %231 : vector<16x128xf32>
    %234 = arith.addf %230, %233 : vector<16x128xf32>
    %cst_127 = arith.constant 5.000000e-01 : f32
    %235 = vector.broadcast %cst_127 : f32 to vector<16x128xf32>
    %236 = arith.cmpf ogt, %234, %235 : vector<16x128xf32>
    %c1_128 = arith.constant 1 : index
    %c0_129 = arith.constant 0 : index
    %c0_130 = arith.constant 0 : index
    %237 = vector.load %arg4[%c1_128, %c0_129, %c0_130] : memref<2x16x128xf32, #tpu.memory_space<vmem>>, vector<1x16x128xf32>
    %238 = vector.shape_cast %237 : vector<1x16x128xf32> to vector<16x128xf32>
    %239 = vector.shape_cast %234 : vector<16x128xf32> to vector<1x16x128xf32>
    tpu.vector_store %arg4[%c1_128, %c0_129, %c0_130], %239 {strides = array<i32>} : memref<2x16x128xf32, #tpu.memory_space<vmem>>, vector<1x16x128xf32>,
    %240 = arith.andi %194, %236 : vector<16x128xi1>
    %241 = arith.ori %194, %236 : vector<16x128xi1>
    %242 = arith.andi %240, %10 : vector<16x128xi1>
    %243 = arith.andi %241, %10 : vector<16x128xi1>
    %cst_131 = arith.constant 0.000000e+00 : f32
    %244 = vector.broadcast %cst_131 : f32 to vector<16x128xf32>
    %245 = arith.select %194, %153, %244 : vector<16x128xi1>, vector<16x128xf32>
    %246 = vector.shape_cast %245 : vector<16x128xf32> to vector<1x16x128xf32>
    %cst_132 = arith.constant dense<0.000000e+00> : vector<1xf32>
    %247 = vector.multi_reduction <add>, %246, %cst_132 [1, 2] : vector<1x16x128xf32> to vector<1xf32>
    %248 = vector.shape_cast %247 : vector<1xf32> to vector<1x1x1xf32>
    %249 = vector.extract %248[0, 0, 0] : f32 from vector<1x1x1xf32>
    %250 = vector.broadcast %249 : f32 to vector<1x1xf32>
    %cst_133 = arith.constant 0.000000e+00 : f32
    %251 = vector.broadcast %cst_133 : f32 to vector<16x128xf32>
    %252 = arith.select %236, %155, %251 : vector<16x128xi1>, vector<16x128xf32>
    %253 = vector.shape_cast %252 : vector<16x128xf32> to vector<1x16x128xf32>
    %cst_134 = arith.constant dense<0.000000e+00> : vector<1xf32>
    %254 = vector.multi_reduction <add>, %253, %cst_134 [1, 2] : vector<1x16x128xf32> to vector<1xf32>
    %255 = vector.shape_cast %254 : vector<1xf32> to vector<1x1x1xf32>
    %256 = vector.extract %255[0, 0, 0] : f32 from vector<1x1x1xf32>
    %257 = vector.broadcast %256 : f32 to vector<1x1xf32>
    %258 = arith.extui %242 : vector<16x128xi1> to vector<16x128xi32>
    %259 = arith.sitofp %258 : vector<16x128xi32> to vector<16x128xf32>
    %260 = vector.shape_cast %259 : vector<16x128xf32> to vector<1x16x128xf32>
    %cst_135 = arith.constant dense<0.000000e+00> : vector<1xf32>
    %261 = vector.multi_reduction <add>, %260, %cst_135 [1, 2] : vector<1x16x128xf32> to vector<1xf32>
    %262 = vector.shape_cast %261 : vector<1xf32> to vector<1x1x1xf32>
    %263 = vector.extract %262[0, 0, 0] : f32 from vector<1x1x1xf32>
    %264 = vector.broadcast %263 : f32 to vector<1x1xf32>
    %265 = arith.extui %243 : vector<16x128xi1> to vector<16x128xi32>
    %266 = arith.sitofp %265 : vector<16x128xi32> to vector<16x128xf32>
    %267 = vector.shape_cast %266 : vector<16x128xf32> to vector<1x16x128xf32>
    %cst_136 = arith.constant dense<0.000000e+00> : vector<1xf32>
    %268 = vector.multi_reduction <add>, %267, %cst_136 [1, 2] : vector<1x16x128xf32> to vector<1xf32>
    %269 = vector.shape_cast %268 : vector<1xf32> to vector<1x1x1xf32>
    %270 = vector.extract %269[0, 0, 0] : f32 from vector<1x1x1xf32>
    %271 = vector.broadcast %270 : f32 to vector<1x1xf32>
    %c0_i32_137 = arith.constant 0 : i32
    %272 = vector.broadcast %c0_i32_137 : i32 to vector<1x4xi32>
    %273 = arith.cmpi eq, %11, %272 : vector<1x4xi32>
    %c1_i32_138 = arith.constant 1 : i32
    %274 = vector.broadcast %c1_i32_138 : i32 to vector<1x4xi32>
    %275 = arith.cmpi eq, %11, %274 : vector<1x4xi32>
    %c2_i32_139 = arith.constant 2 : i32
    %276 = vector.broadcast %c2_i32_139 : i32 to vector<1x4xi32>
    %277 = arith.cmpi eq, %11, %276 : vector<1x4xi32>
    %278 = vector.shape_cast %264 : vector<1x1xf32> to vector<1x1xf32>
    %279 = vector.broadcast %278 : vector<1x1xf32> to vector<1x4xf32>
    %280 = vector.shape_cast %271 : vector<1x1xf32> to vector<1x1xf32>
    %281 = vector.broadcast %280 : vector<1x1xf32> to vector<1x4xf32>
    %282 = arith.select %277, %279, %281 : vector<1x4xi1>, vector<1x4xf32>
    %283 = vector.shape_cast %257 : vector<1x1xf32> to vector<1x1xf32>
    %284 = vector.broadcast %283 : vector<1x1xf32> to vector<1x4xf32>
    %285 = arith.select %275, %284, %282 : vector<1x4xi1>, vector<1x4xf32>
    %286 = vector.shape_cast %250 : vector<1x1xf32> to vector<1x1xf32>
    %287 = vector.broadcast %286 : vector<1x1xf32> to vector<1x4xf32>
    %288 = arith.select %273, %287, %285 : vector<1x4xi1>, vector<1x4xf32>
    %c1_140 = arith.constant 1 : index
    %c0_141 = arith.constant 0 : index
    %c0_142 = arith.constant 0 : index
    %289 = vector.load %arg5[%c1_140, %c0_141, %c0_142] : memref<2x1x4xf32, #tpu.memory_space<vmem>>, vector<1x1x4xf32>
    %290 = vector.shape_cast %289 : vector<1x1x4xf32> to vector<1x4xf32>
    %291 = vector.shape_cast %288 : vector<1x4xf32> to vector<1x1x4xf32>
    tpu.vector_store %arg5[%c1_140, %c0_141, %c0_142], %291 {strides = array<i32>} : memref<2x1x4xf32, #tpu.memory_space<vmem>>, vector<1x1x4xf32>,
    return
  }
  func.func @transform_0(%arg0: i32) -> (i32, i32, i32) {
    %c0_i32 = arith.constant 0 : i32
    %c0_i32_0 = arith.constant 0 : i32
    %c0_i32_1 = arith.constant 0 : i32
    return %arg0, %c0_i32, %c0_i32_0 : i32, i32, i32
  }
  func.func @transform_1(%arg0: i32) -> (i32, i32, i32) {
    %c0_i32 = arith.constant 0 : i32
    %c0_i32_0 = arith.constant 0 : i32
    %c0_i32_1 = arith.constant 0 : i32
    return %arg0, %c0_i32, %c0_i32_0 : i32, i32, i32
  }
  func.func @transform_2(%arg0: i32) -> (i32, i32, i32) {
    %c0_i32 = arith.constant 0 : i32
    %c0_i32_0 = arith.constant 0 : i32
    %c0_i32_1 = arith.constant 0 : i32
    return %arg0, %c0_i32, %c0_i32_0 : i32, i32, i32
  }
  func.func @transform_3(%arg0: i32) -> (i32, i32, i32) {
    %c0_i32 = arith.constant 0 : i32
    %c0_i32_0 = arith.constant 0 : i32
    %c0_i32_1 = arith.constant 0 : i32
    return %arg0, %c0_i32, %c0_i32_0 : i32, i32, i32
  }
  func.func @transform_4(%arg0: i32) -> (i32, i32, i32) {
    %c0_i32 = arith.constant 0 : i32
    %c0_i32_0 = arith.constant 0 : i32
    %c0_i32_1 = arith.constant 0 : i32
    return %arg0, %c0_i32, %c0_i32_0 : i32, i32, i32
  }
}

</mosaic_0001>

<bundles_post_ra>
// kernel: tpu_custom_call.1
= control target key start
LH: loop header
LB: loop body
LE: loop exit
PB: predicated region body
PF: predicated region fallthrough
CT: control target
= control target key end

     0   :  { %10 = vsyncpa [#allocation4], 0  ;;  %s981_s0 = inlined_call_operand.hbm [shape: f32[2,16,128], index: 0, kind: input, shape index: {}]   ;;  %s982_s1 = inlined_call_operand.hbm [shape: f32[2,16,128], index: 1, kind: input, shape index: {}]   ;;  %s983_s2 = inlined_call_operand.hbm [shape: f32[2,16,128], index: 2, kind: output, shape index: {0}]   ;;  %s984_s3 = inlined_call_operand.hbm [shape: f32[2,16,128], index: 3, kind: output, shape index: {1}]   ;;  %s985_s4 = inlined_call_operand.hbm [shape: f32[2,1,4], index: 4, kind: output, shape index: {2}]  }
   0x1   :  { %11 = vsyncpa [#allocation7], 0 }
   0x2   :  { %12 = vsyncpa [#allocation5], 0 }
   0x3   :  { %13 = vsyncpa [#allocation10], 0  ;;  %s677_s15 = smov [#allocation3]   ;;  %s559_s19 = scalar_lea.hbm %s981_s0, 512 }
   0x4   :  { %s19_s16 = sshll.u32 %s677_s15, 4  ;;  %p560_p0 = scmp.ne.s32.totalorder %s981_s0, %s559_s19  ;;  %s20_s16 = int_to_ptr.vmem [resolvable:$true] %s19_s16 }
   0x5   :  { %p563_p1 = scmp.lt.u32.totalorder %s559_s19, %s981_s0 }
   0x7   :  { %p565_p2 = pnand %p563_p1, %p560_p0 }
   0x9   :  { %568 = shalt.err (!%p565_p2)
}
   0xa   :  { %s569_s24 = scalar_lea.vmem %s20_s16, 512  ;;  %p574_p4 = scmp.lt.s32.totalorder %s20_s16, %s20_s16 }
   0xb   :  { %p570_p3 = scmp.ne.s32.totalorder %s20_s16, %s569_s24  ;;  %p575_p5 = scmp.lt.s32.totalorder %s569_s24, %s569_s24 }
   0xd   :  { %p576_p6 = por %p575_p5, %p574_p4 }
   0xf   :  { %p577_p7 = pnand %p576_p6, %p570_p3 }
  0x11   :  { %580 = shalt.err (!%p577_p7)
}
  0x12   :  { %s678_s25 = smov 128   ;;  %s679_s26 = smov 8  }
  0x13   :  { %25 = dma.hbm_to_vmem [thread:$0]  %s981_s0, 512, %s20_s16, [#allocation4], %s678_s25, %s678_s25, %s679_s26  }
  0x14   :  { %s680_s29 = smov [#allocation6]   ;;  %s581_s7 = scalar_lea.hbm %s982_s1, 512 }
  0x15   :  { %s31_s30 = sshll.u32 %s680_s29, 4  ;;  %p582_p8 = scmp.ne.s32.totalorder %s982_s1, %s581_s7  ;;  %s32_s30 = int_to_ptr.vmem [resolvable:$true] %s31_s30 }
  0x16   :  { %p585_p9 = scmp.lt.u32.totalorder %s581_s7, %s982_s1 }
  0x18   :  { %p587_p10 = pnand %p585_p9, %p582_p8 }
  0x1a   :  { %590 = shalt.err (!%p587_p10)
}
  0x1b   :  { %s591_s12 = scalar_lea.vmem %s32_s30, 512  ;;  %p596_p12 = scmp.lt.s32.totalorder %s32_s30, %s32_s30 }
  0x1c   :  { %p592_p11 = scmp.ne.s32.totalorder %s32_s30, %s591_s12  ;;  %p597_p13 = scmp.lt.s32.totalorder %s591_s12, %s591_s12 }
  0x1e   :  { %p598_p0 = por %p597_p13, %p596_p12 }
  0x20   :  { %p599_p1 = pnand %p598_p0, %p592_p11 }
  0x22   :  { %602 = shalt.err (!%p599_p1)
}
  0x23   :  { %37 = dma.hbm_to_vmem [thread:$0]  %s982_s1, 512, %s32_s30, [#allocation7], %s678_s25, %s678_s25, %s679_s26  }
  0x24   :  { %669 = dma.done.wait [#allocation4], 512  }
  0x25   :  { %670 = vsyncadd [#allocation4], 4294966784 }
  0x26   :  { %671 = dma.done.wait [#allocation7], 512  }
  0x27   :  { %672 = vsyncadd [#allocation7], 4294966784  ;;  %v681_v0 = vmov 0.0   ;;  %v747_v1 = vld [vmem:[#allocation3] sm:$0xff]  ;;  %s682_s14 = smov 1   ;;  %s683_s15 = smov 2  }
  0x28   :  { %45 = vst [vmem:[#allocation2 + $0x12] sm:$0x3] %v681_v0  ;;  %44 = vst [vmem:[#allocation2] sm:$0x3] %v681_v0  ;;  %70 = vrot.lane.b32.xlu1 %v747_v1, %s682_s14  ;;  %62 = vrot.lane.b32.xlu0 %v747_v1, %s683_s15  ;;  %v753_v2 = vld [vmem:[#allocation3 + $0x8] sm:$0xff]  ;;  %s684_s1 = smov 127  }
  0x29   :  { %s685_s16 = smov 126   ;;  %v767_v3 = vld [vmem:[#allocation6 + $0x8] sm:$0xff]  ;;  %v769_v4 = vld [vmem:[#allocation6] sm:$0xff]  ;;  %v787_v5 = vld [vmem:[#allocation3 + $0x18] sm:$0xff]  ;;  %v60_v11 = vmul.f32 0.2920817, %v747_v1 }
  0x2a   :  { %v789_v6 = vld [vmem:[#allocation3 + $0x10] sm:$0xff]  ;;  %v807_v7 = vld [vmem:[#allocation6 + $0x18] sm:$0xff]  ;;  %v61_v13 = vmul.f32 0.2920817, %v753_v2  ;;  %v127_v37 = vmul.f32 0.2920817, %v767_v3 }
  0x2b   :  { %v809_v8 = vld [vmem:[#allocation6 + $0x10] sm:$0xff]  ;;  %v126_v39 = vmul.f32 0.2920817, %v769_v4  ;;  %s686_s17 = smov [#allocation9]   ;;  %s687_s19 = smov [#allocation8]  }
  0x2c   :  { %72 = vrot.lane.b32.xlu1 %v753_v2, %s682_s14  ;;  %64 = vrot.lane.b32.xlu0 %v753_v2, %s683_s15  ;;  %s490_s18 = sshll.u32 %s686_s17, 4  ;;  %s478_s20 = sshll.u32 %s687_s19, 4  ;;  %s491_s18 = int_to_ptr.vmem [resolvable:$true] %s490_s18  ;;  %s914_s20 = int_to_ptr.vmem [resolvable:$true] %s478_s20 }
  0x2d   :  { %s603_s21 = scalar_lea.vmem %s491_s18, 512  ;;  %p608_p3 = scmp.lt.s32.totalorder %s491_s18, %s491_s18 }
  0x2e   :  { %p604_p2 = scmp.ne.s32.totalorder %s491_s18, %s603_s21  ;;  %p609_p4 = scmp.lt.s32.totalorder %s603_s21, %s603_s21 }
  0x30   :  { %80 = vrot.lane.b32.xlu1 %v753_v2, %s684_s1  ;;  %78 = vrot.lane.b32.xlu0 %v747_v1, %s684_s1  ;;  %p610_p5 = por %p609_p4, %p608_p3 }
  0x32   :  { %p611_p6 = pnand %p610_p5, %p604_p2 }
  0x34   :  { %88 = vrot.lane.b32.xlu1 %v753_v2, %s685_s16  ;;  %86 = vrot.lane.b32.xlu0 %v747_v1, %s685_s16 }
  0x38   :  { %130 = vrot.lane.b32.xlu1 %v767_v3, %s683_s15  ;;  %128 = vrot.lane.b32.xlu0 %v769_v4, %s683_s15 }
  0x3c   :  { %138 = vrot.lane.b32.xlu1 %v767_v3, %s682_s14  ;;  %136 = vrot.lane.b32.xlu0 %v769_v4, %s682_s14 }
  0x40   :  { %146 = vrot.lane.b32.xlu1 %v767_v3, %s684_s1  ;;  %144 = vrot.lane.b32.xlu0 %v769_v4, %s684_s1 }
  0x44   :  { %154 = vrot.lane.b32.xlu1 %v767_v3, %s685_s16  ;;  %152 = vrot.lane.b32.xlu0 %v769_v4, %s685_s16 }
  0x48   :  { %274 = vrot.lane.b32.xlu1 %v787_v5, %s683_s15  ;;  %272 = vrot.lane.b32.xlu0 %v789_v6, %s683_s15 }
  0x4c   :  { %282 = vrot.lane.b32.xlu1 %v787_v5, %s682_s14  ;;  %280 = vrot.lane.b32.xlu0 %v789_v6, %s682_s14 }
  0x50   :  { %290 = vrot.lane.b32.xlu1 %v787_v5, %s684_s1  ;;  %288 = vrot.lane.b32.xlu0 %v789_v6, %s684_s1 }
  0x54   :  { %298 = vrot.lane.b32.xlu1 %v787_v5, %s685_s16  ;;  %296 = vrot.lane.b32.xlu0 %v789_v6, %s685_s16 }
  0x58   :  { %341 = vrot.lane.b32.xlu1 %v807_v7, %s683_s15  ;;  %339 = vrot.lane.b32.xlu0 %v809_v8, %s683_s15 }
  0x5c   :  { %349 = vrot.lane.b32.xlu1 %v807_v7, %s682_s14  ;;  %347 = vrot.lane.b32.xlu0 %v809_v8, %s682_s14 }
  0x60   :  { %357 = vrot.lane.b32.xlu1 %v807_v7, %s684_s1  ;;  %355 = vrot.lane.b32.xlu0 %v809_v8, %s684_s1 }
  0x64   :  { %365 = vrot.lane.b32.xlu1 %v807_v7, %s685_s16  ;;  %363 = vrot.lane.b32.xlu0 %v809_v8, %s685_s16 }
  0x9a   :  { %v71_v9 = vpop.permute.xlu1 %70  ;;  %v63_v10 = vpop.permute.xlu0 %62 }
  0x9b   :  { %v66_v12 = vmul.f32 0.120078385, %v63_v10  ;;  %v74_v22 = vmul.f32 0.23388076, %v71_v9 }
  0x9d   :  { %v68_v17 = vadd.f32 %v66_v12, %v60_v11 }
  0x9e   :  { %v73_v14 = vpop.permute.xlu1 %72  ;;  %v65_v15 = vpop.permute.xlu0 %64 }
  0x9f   :  { %v67_v16 = vmul.f32 0.120078385, %v65_v15  ;;  %v75_v18 = vmul.f32 0.23388076, %v73_v14  ;;  %v76_v26 = vadd.f32 %v74_v22, %v68_v17 }
  0xa1   :  { %v69_v19 = vadd.f32 %v67_v16, %v61_v13 }
  0xa2   :  { %v81_v20 = vpop.permute.xlu1 %80  ;;  %v79_v21 = vpop.permute.xlu0 %78 }
  0xa3   :  { %v77_v23 = vadd.f32 %v75_v18, %v69_v19  ;;  %v83_v24 = vmul.f32 0.23388076, %v81_v20  ;;  %v82_v25 = vmul.f32 0.23388076, %v79_v21 }
  0xa5   :  { %v85_v29 = vadd.f32 %v83_v24, %v77_v23  ;;  %v84_v30 = vadd.f32 %v82_v25, %v76_v26 }
  0xa6   :  { %v89_v27 = vpop.permute.xlu1 %88  ;;  %v87_v28 = vpop.permute.xlu0 %86 }
  0xa7   :  { %v91_v31 = vmul.f32 0.120078385, %v89_v27  ;;  %v90_v32 = vmul.f32 0.120078385, %v87_v28 }
  0xa9   :  { %v93_v33 = vadd.f32 %v91_v31, %v85_v29  ;;  %v92_v34 = vadd.f32 %v90_v32, %v84_v30 }
  0xaa   :  { %v131_v35 = vpop.permute.xlu1 %130  ;;  %v129_v36 = vpop.permute.xlu0 %128 }
  0xab   :  { %95 = vst [vmem:[#allocation2 + $0xa] sm:$0xff] %v93_v33  ;;  %94 = vst [vmem:[#allocation2 + $0x2] sm:$0xff] %v92_v34  ;;  %v133_v38 = vmul.f32 0.120078385, %v131_v35  ;;  %v132_v40 = vmul.f32 0.120078385, %v129_v36 }
  0xac   :  { %v96_v50 = vmul.f32 0.2920817, %v92_v34  ;;  %v97_v63 = vmul.f32 0.2920817, %v93_v33  ;;  %v271_v33 = vmul.f32 0.2920817, %v787_v5 }
  0xad   :  { %v135_v46 = vadd.f32 %v133_v38, %v127_v37  ;;  %v134_v47 = vadd.f32 %v132_v40, %v126_v39  ;;  %v270_v35 = vmul.f32 0.2920817, %v789_v6 }
  0xae   :  { %v139_v41 = vpop.permute.xlu1 %138  ;;  %v137_v42 = vpop.permute.xlu0 %136 }
  0xaf   :  { %v141_v43 = vmul.f32 0.23388076, %v139_v41  ;;  %v140_v44 = vmul.f32 0.23388076, %v137_v42 }
  0xb1   :  { %v143_v56 = vadd.f32 %v141_v43, %v135_v46  ;;  %v142_v57 = vadd.f32 %v140_v44, %v134_v47 }
  0xb2   :  { %v98_v45 = vld [vmem:[#allocation2] sm:$0xff]  ;;  %v147_v48 = vpop.permute.xlu1 %146  ;;  %v145_v49 = vpop.permute.xlu0 %144  ;;  %v99_v51 = vld [vmem:[#allocation2 + $0x8] sm:$0xff] }
  0xb3   :  { %v100_v52 = vmul.f32 0.120078385, %v98_v45  ;;  %v104_v53 = vld [vmem:[#allocation2 + $0x1] sm:$0xff]  ;;  %v105_v54 = vld [vmem:[#allocation2 + $0x9] sm:$0xff]  ;;  %v149_v58 = vmul.f32 0.23388076, %v147_v48 }
  0xb4   :  { %v110_v55 = vld [vmem:[#allocation2 + $0x3] sm:$0xff]  ;;  %v106_v60 = vmul.f32 0.23388076, %v104_v53  ;;  %v148_v61 = vmul.f32 0.23388076, %v145_v49  ;;  %v111_v14 = vld [vmem:[#allocation2 + $0xb] sm:$0xff] }
  0xb5   :  { %v102_v59 = vadd.f32 %v100_v52, %v96_v50  ;;  %v101_v62 = vmul.f32 0.120078385, %v99_v51  ;;  %v116_v9 = vld [vmem:[#allocation2 + $0x4] sm:$0xff]  ;;  %v151_v10 = vadd.f32 %v149_v58, %v143_v56  ;;  %v112_v13 = vmul.f32 0.23388076, %v110_v55  ;;  %v117_v21 = vld [vmem:[#allocation2 + $0xc] sm:$0xff] }
  0xb6   :  { %v155_v11 = vpop.permute.xlu1 %154  ;;  %v153_v12 = vpop.permute.xlu0 %152  ;;  %v150_v16 = vadd.f32 %v148_v61, %v142_v57  ;;  %v107_v20 = vmul.f32 0.23388076, %v105_v54  ;;  %v118_v25 = vmul.f32 0.120078385, %v116_v9  ;;  %v113_v29 = vmul.f32 0.23388076, %v111_v14 }
  0xb7   :  { %v108_v15 = vadd.f32 %v106_v60, %v102_v59  ;;  %v157_v17 = vmul.f32 0.120078385, %v155_v11  ;;  %v156_v18 = vmul.f32 0.120078385, %v153_v12  ;;  %v103_v19 = vadd.f32 %v101_v62, %v97_v63 }
  0xb8   :  { %v119_v32 = vmul.f32 0.120078385, %v117_v21  ;;  %v46_v58 = vlaneseq }
  0xb9   :  { %v159_v22 = vadd.f32 %v157_v17, %v151_v10  ;;  %v158_v23 = vadd.f32 %v156_v18, %v150_v16  ;;  %v114_v24 = vadd.f32 %v112_v13, %v108_v15  ;;  %v109_v28 = vadd.f32 %v107_v20, %v103_v19 }
  0xba   :  { %v275_v26 = vpop.permute.xlu1 %274  ;;  %v273_v27 = vpop.permute.xlu0 %272  ;;  %v847_v20 = vand.u32 127, %v46_v58 }
  0xbb   :  { %161 = vst [vmem:[#allocation2 + $0xa] sm:$0xff] %v159_v22  ;;  %160 = vst [vmem:[#allocation2 + $0x2] sm:$0xff] %v158_v23  ;;  %v831_v30 = vadd.f32 %v118_v25, %v114_v24  ;;  %v115_v31 = vadd.f32 %v113_v29, %v109_v28  ;;  %v277_v34 = vmul.f32 0.120078385, %v275_v26  ;;  %v276_v36 = vmul.f32 0.120078385, %v273_v27 }
  0xbc   :  { %v162_v50 = vmul.f32 0.2920817, %v158_v23  ;;  %v163_v62 = vmul.f32 0.2920817, %v159_v22  ;;  %vm53_vm2 = vcmp.lt.s32.totalorder %v847_v20, 16 }
  0xbd   :  { %vm122_vm0 = vcmp.gt.f32.partialorder %v831_v30, 0.5  ;;  %124 = vst [vmem:[#allocation8] sm:$0xff] %v831_v30  ;;  %v837_v39 = vadd.f32 %v119_v32, %v115_v31  ;;  %v279_v45 = vadd.f32 %v277_v34, %v271_v33  ;;  %v278_v46 = vadd.f32 %v276_v36, %v270_v35 }
  0xbe   :  { %v283_v37 = vpop.permute.xlu1 %282  ;;  %v281_v38 = vpop.permute.xlu0 %280  ;;  %v200_v40 = vsel %vm122_vm0, %v747_v1, 0.0  ;;  %v338_v34 = vmul.f32 0.2920817, %v807_v7  ;;  %v337_v36 = vmul.f32 0.2920817, %v809_v8 }
  0xbf   :  { %v285_v41 = vmul.f32 0.23388076, %v283_v37  ;;  %v284_v42 = vmul.f32 0.23388076, %v281_v38  ;;  %vm123_vm1 = vcmp.gt.f32.partialorder %v837_v39, 0.5  ;;  %125 = vst [vmem:[#allocation8 + $0x8] sm:$0xff] %v837_v39 }
  0xc0   :  { %v201_v43 = vsel %vm123_vm1, %v753_v2, 0.0 }
  0xc1   :  { %v202_v47 = vadd.f32 %v201_v43, %v200_v40  ;;  %v287_v55 = vadd.f32 %v285_v41, %v279_v45  ;;  %v286_v56 = vadd.f32 %v284_v42, %v278_v46 }
  0xc2   :  { %v164_v44 = vld [vmem:[#allocation2] sm:$0xff]  ;;  %v291_v48 = vpop.permute.xlu1 %290  ;;  %v289_v49 = vpop.permute.xlu0 %288  ;;  %v165_v51 = vld [vmem:[#allocation2 + $0x8] sm:$0xff] }
  0xc3   :  { %v166_v52 = vmul.f32 0.120078385, %v164_v44  ;;  %v170_v1 = vld [vmem:[#allocation2 + $0x1] sm:$0xff]  ;;  %v171_v53 = vld [vmem:[#allocation2 + $0x9] sm:$0xff]  ;;  %203 = vadd.xlane.f32.xlu0 %v202_v47  ;;  %v293_v57 = vmul.f32 0.23388076, %v291_v48 }
  0xc4   :  { %v176_v54 = vld [vmem:[#allocation2 + $0x3] sm:$0xff]  ;;  %v172_v60 = vmul.f32 0.23388076, %v170_v1  ;;  %v292_v2 = vmul.f32 0.23388076, %v289_v49  ;;  %v177_v13 = vld [vmem:[#allocation2 + $0xb] sm:$0xff] }
  0xc5   :  { %v168_v59 = vadd.f32 %v166_v52, %v162_v50  ;;  %v167_v61 = vmul.f32 0.120078385, %v165_v51  ;;  %v182_v63 = vld [vmem:[#allocation2 + $0x4] sm:$0xff]  ;;  %v295_v9 = vadd.f32 %v293_v57, %v287_v55  ;;  %v178_v12 = vmul.f32 0.23388076, %v176_v54  ;;  %v183_v21 = vld [vmem:[#allocation2 + $0xc] sm:$0xff] }
  0xc6   :  { %v299_v10 = vpop.permute.xlu1 %298  ;;  %v297_v11 = vpop.permute.xlu0 %296  ;;  %v294_v15 = vadd.f32 %v292_v2, %v286_v56  ;;  %v173_v19 = vmul.f32 0.23388076, %v171_v53  ;;  %v184_v26 = vmul.f32 0.120078385, %v182_v63  ;;  %v179_v29 = vmul.f32 0.23388076, %v177_v13 }
  0xc7   :  { %v174_v14 = vadd.f32 %v172_v60, %v168_v59  ;;  %v301_v16 = vmul.f32 0.120078385, %v299_v10  ;;  %v300_v17 = vmul.f32 0.120078385, %v297_v11  ;;  %v169_v18 = vadd.f32 %v167_v61, %v163_v62 }
  0xc8   :  { %v185_v33 = vmul.f32 0.120078385, %v183_v21 }
  0xc9   :  { %v303_v23 = vadd.f32 %v301_v16, %v295_v9  ;;  %v302_v24 = vadd.f32 %v300_v17, %v294_v15  ;;  %v180_v25 = vadd.f32 %v178_v12, %v174_v14  ;;  %v175_v28 = vadd.f32 %v173_v19, %v169_v18 }
  0xca   :  { %v342_v22 = vpop.permute.xlu1 %341  ;;  %v340_v27 = vpop.permute.xlu0 %339 }
  0xcb   :  { %305 = vst [vmem:[#allocation2 + $0xa] sm:$0xff] %v303_v23  ;;  %304 = vst [vmem:[#allocation2 + $0x2] sm:$0xff] %v302_v24  ;;  %v186_v31 = vadd.f32 %v184_v26, %v180_v25  ;;  %v181_v32 = vadd.f32 %v179_v29, %v175_v28  ;;  %v344_v35 = vmul.f32 0.120078385, %v342_v22  ;;  %v343_v37 = vmul.f32 0.120078385, %v340_v27 }
  0xcc   :  { %v306_v55 = vmul.f32 0.2920817, %v302_v24 }
  0xcd   :  { %vm188_vm3 = vcmp.gt.f32.partialorder %v186_v31, 0.5  ;;  %190 = vst [vmem:[#allocation9] sm:$0xff] %v186_v31  ;;  %v187_v41 = vadd.f32 %v185_v33, %v181_v32  ;;  %v346_v47 = vadd.f32 %v344_v35, %v338_v34  ;;  %v345_v52 = vadd.f32 %v343_v37, %v337_v36 }
  0xce   :  { %v350_v38 = vpop.permute.xlu1 %349  ;;  %v348_v40 = vpop.permute.xlu0 %347  ;;  %vm192_vm4 = vmand %vm122_vm0, %vm188_vm3  ;;  %v212_v43 = vsel %vm188_vm3, %v769_v4, 0.0  ;;  %v307_v4 = vmul.f32 0.2920817, %v303_v23 }
  0xcf   :  { %v352_v42 = vmul.f32 0.23388076, %v350_v38  ;;  %vm857_vm5 = vmand %vm192_vm4, %vm53_vm2  ;;  %v351_v45 = vmul.f32 0.23388076, %v348_v40  ;;  %vm189_vm6 = vcmp.gt.f32.partialorder %v187_v41, 0.5  ;;  %191 = vst [vmem:[#allocation9 + $0x8] sm:$0xff] %v187_v41 }
  0xd0   :  { %vm863_vm7 = vmor %vm122_vm0, %vm188_vm3  ;;  %v213_v48 = vsel %vm189_vm6, %v767_v3, 0.0  ;;  %v522_v54 = vsel %vm857_vm5, 1.0, %v681_v0 }
  0xd1   :  { %vm193_vm8 = vmand %vm123_vm1, %vm189_vm6  ;;  %v214_v1 = vadd.f32 %v213_v48, %v212_v43  ;;  %v354_v3 = vadd.f32 %v352_v42, %v346_v47  ;;  %v353_v58 = vadd.f32 %v351_v45, %v345_v52 }
  0xd2   :  { %v308_v49 = vld [vmem:[#allocation2] sm:$0xff]  ;;  %v309_v50 = vld [vmem:[#allocation2 + $0x8] sm:$0xff]  ;;  %v358_v53 = vpop.permute.xlu1 %357  ;;  %v356_v30 = vpop.permute.xlu0 %355  ;;  %vm197_vm9 = vmand %vm193_vm8, %vm53_vm2 }
  0xd3   :  { %v314_v51 = vld [vmem:[#allocation2 + $0x1] sm:$0xff]  ;;  %v310_v56 = vmul.f32 0.120078385, %v308_v49  ;;  %215 = vadd.xlane.f32.xlu1 %v214_v1  ;;  %v360_v59 = vmul.f32 0.23388076, %v358_v53  ;;  %v523_v2 = vsel %vm197_vm9, 1.0, %v681_v0  ;;  %vm195_vm10 = vmor %vm123_vm1, %vm189_vm6 }
  0xd4   :  { %v320_v57 = vld [vmem:[#allocation2 + $0x3] sm:$0xff]  ;;  %v359_v60 = vmul.f32 0.23388076, %v356_v30  ;;  %v316_v63 = vmul.f32 0.23388076, %v314_v51  ;;  %v228_v9 = vadd.f32 %v523_v2, %v522_v54  ;;  %vm198_vm11 = vmand %vm863_vm7, %vm53_vm2  ;;  %v321_v23 = vld [vmem:[#allocation2 + $0xb] sm:$0xff] }
  0xd5   :  { %v312_v61 = vadd.f32 %v310_v56, %v306_v55  ;;  %v315_v62 = vld [vmem:[#allocation2 + $0x9] sm:$0xff]  ;;  %v311_v10 = vmul.f32 0.120078385, %v309_v50  ;;  %v362_v12 = vadd.f32 %v360_v59, %v354_v3  ;;  %vm199_vm12 = vmand %vm195_vm10, %vm53_vm2  ;;  %v524_v39 = vsel %vm198_vm11, 1.0, %v681_v0 }
  0xd6   :  { %v326_v11 = vld [vmem:[#allocation2 + $0x4] sm:$0xff]  ;;  %v361_v13 = vadd.f32 %v359_v60, %v353_v58  ;;  %v366_v14 = vpop.permute.xlu1 %365  ;;  %v364_v15 = vpop.permute.xlu0 %363  ;;  %v322_v16 = vmul.f32 0.23388076, %v320_v57  ;;  %229 = vadd.xlane.f32.xlu0 %v228_v9  ;;  %v525_v21 = vsel %vm199_vm12, 1.0, %v681_v0  ;;  %v317_v26 = vmul.f32 0.23388076, %v315_v62 }
  0xd7   :  { %v318_v17 = vadd.f32 %v316_v63, %v312_v61  ;;  %v368_v18 = vmul.f32 0.120078385, %v366_v14  ;;  %v367_v19 = vmul.f32 0.120078385, %v364_v15  ;;  %v242_v24 = vadd.f32 %v525_v21, %v524_v39  ;;  %v327_v29 = vld [vmem:[#allocation2 + $0xc] sm:$0xff] }
  0xd8   :  { %v313_v25 = vadd.f32 %v311_v10, %v307_v4  ;;  %v328_v31 = vmul.f32 0.120078385, %v326_v11  ;;  %v323_v33 = vmul.f32 0.23388076, %v321_v23  ;;  %v329_v36 = vmul.f32 0.120078385, %v327_v29 }
  0xd9   :  { %v370_v22 = vadd.f32 %v368_v18, %v362_v12  ;;  %v369_v27 = vadd.f32 %v367_v19, %v361_v13  ;;  %v324_v28 = vadd.f32 %v322_v16, %v318_v17 }
  0xda   :  { %v319_v32 = vadd.f32 %v317_v26, %v313_v25  ;;  %243 = vadd.xlane.f32.xlu0 %v242_v24 }
  0xdb   :  { %371 = vst [vmem:[#allocation2 + $0x2] sm:$0xff] %v369_v27  ;;  %v330_v34 = vadd.f32 %v328_v31, %v324_v28  ;;  %372 = vst [vmem:[#allocation2 + $0xa] sm:$0xff] %v370_v22  ;;  %v374_v41 = vmul.f32 0.2920817, %v370_v22  ;;  %v373_v46 = vmul.f32 0.2920817, %v369_v27 }
  0xdc   :  { %v325_v35 = vadd.f32 %v323_v33, %v319_v32 }
  0xdd   :  { %vm332_vm13 = vcmp.gt.f32.partialorder %v330_v34, 0.5  ;;  %335 = vst [vmem:[#allocation8 + $0x10] sm:$0xff] %v330_v34 }
  0xde   :  { %v331_v37 = vadd.f32 %v329_v36, %v325_v35  ;;  %v412_v38 = vsel %vm332_vm13, %v789_v6, 0.0 }
  0xe0   :  { %vm333_vm14 = vcmp.gt.f32.partialorder %v331_v37, 0.5  ;;  %336 = vst [vmem:[#allocation8 + $0x18] sm:$0xff] %v331_v37 }
  0xe1   :  { %v413_v40 = vsel %vm333_vm14, %v787_v5, 0.0 }
  0xe2   :  { %v375_v42 = vld [vmem:[#allocation2] sm:$0xff]  ;;  %v414_v44 = vadd.f32 %v413_v40, %v412_v38  ;;  %v376_v45 = vld [vmem:[#allocation2 + $0x8] sm:$0xff] }
  0xe3   :  { %v381_v43 = vld [vmem:[#allocation2 + $0x1] sm:$0xff]  ;;  %v377_v47 = vmul.f32 0.120078385, %v375_v42  ;;  %v378_v48 = vmul.f32 0.120078385, %v376_v45  ;;  %v382_v4 = vld [vmem:[#allocation2 + $0x9] sm:$0xff] }
  0xe4   :  { %415 = vadd.xlane.f32.xlu1 %v414_v44  ;;  %v387_v49 = vld [vmem:[#allocation2 + $0x3] sm:$0xff]  ;;  %v388_v50 = vld [vmem:[#allocation2 + $0xb] sm:$0xff]  ;;  %v383_v52 = vmul.f32 0.23388076, %v381_v43  ;;  %v384_v1 = vmul.f32 0.23388076, %v382_v4 }
  0xe5   :  { %v379_v51 = vadd.f32 %v377_v47, %v373_v46  ;;  %v380_v6 = vadd.f32 %v378_v48, %v374_v41  ;;  %v393_v53 = vld [vmem:[#allocation2 + $0x4] sm:$0xff]  ;;  %v394_v30 = vld [vmem:[#allocation2 + $0xc] sm:$0xff]  ;;  %v389_v55 = vmul.f32 0.23388076, %v387_v49  ;;  %v390_v56 = vmul.f32 0.23388076, %v388_v50 }
  0xe6   :  { %v395_v58 = vmul.f32 0.120078385, %v393_v53  ;;  %v396_v59 = vmul.f32 0.120078385, %v394_v30 }
  0xe7   :  { %v385_v54 = vadd.f32 %v383_v52, %v379_v51  ;;  %v386_v5 = vadd.f32 %v384_v1, %v380_v6 }
  0xe9   :  { %v391_v57 = vadd.f32 %v389_v55, %v385_v54  ;;  %v392_v3 = vadd.f32 %v390_v56, %v386_v5 }
  0xeb   :  { %v397_v60 = vadd.f32 %v395_v58, %v391_v57  ;;  %v398_v2 = vadd.f32 %v396_v59, %v392_v3 }
  0xed   :  { %vm399_vm15 = vcmp.gt.f32.partialorder %v397_v60, 0.5  ;;  %vm400_vm0 = vcmp.gt.f32.partialorder %v398_v2, 0.5  ;;  %402 = vst [vmem:[#allocation9 + $0x10] sm:$0xff] %v397_v60  ;;  %403 = vst [vmem:[#allocation9 + $0x18] sm:$0xff] %v398_v2 }
  0xee   :  { %v424_v61 = vsel %vm399_vm15, %v809_v8, 0.0  ;;  %v425_v62 = vsel %vm400_vm0, %v807_v7, 0.0  ;;  %vm404_vm1 = vmand %vm332_vm13, %vm399_vm15 }
  0xef   :  { %v426_v63 = vadd.f32 %v425_v62, %v424_v61  ;;  %vm405_vm3 = vmand %vm333_vm14, %vm400_vm0 }
  0xf0   :  { %vm408_vm4 = vmand %vm404_vm1, %vm53_vm2 }
  0xf1   :  { %427 = vadd.xlane.f32.xlu0 %v426_v63  ;;  %vm409_vm5 = vmand %vm405_vm3, %vm53_vm2  ;;  %v526_v9 = vsel %vm408_vm4, 1.0, %v681_v0 }
  0xf2   :  { %v527_v8 = vsel %vm409_vm5, 1.0, %v681_v0  ;;  %vm406_vm6 = vmor %vm332_vm13, %vm399_vm15 }
  0xf3   :  { %v440_v7 = vadd.f32 %v527_v8, %v526_v9  ;;  %vm407_vm7 = vmor %vm333_vm14, %vm400_vm0 }
  0xf4   :  { %vm410_vm8 = vmand %vm406_vm6, %vm53_vm2 }
  0xf5   :  { %441 = vadd.xlane.f32.xlu1 %v440_v7  ;;  %vm411_vm9 = vmand %vm407_vm7, %vm53_vm2  ;;  %v528_v10 = vsel %vm410_vm8, 1.0, %v681_v0 }
  0xf6   :  { %v529_v11 = vsel %vm411_vm9, 1.0, %v681_v0 }
  0xf7   :  { %v454_v12 = vadd.f32 %v529_v11, %v528_v10 }
  0xf9   :  { %455 = vadd.xlane.f32.xlu0 %v454_v12 }
  0xfa   :  { %614 = shalt.err (!%p611_p6)
}
  0xfb   :  { %s615_s24 = scalar_lea.hbm %s984_s3, 512 }
  0xfc   :  { %p616_p7 = scmp.ne.s32.totalorder %s984_s3, %s615_s24  ;;  %p619_p8 = scmp.lt.u32.totalorder %s615_s24, %s984_s3 }
  0xfe   :  { %p621_p9 = pnand %p619_p8, %p616_p7 }
 0x100   :  { %624 = shalt.err (!%p621_p9)
}
 0x101   :  { %496 = dma.vmem_to_hbm [thread:$0]  %s491_s18, 512, %s984_s3, [#allocation10], %s678_s25, %s678_s25, %s679_s26  }
 0x102   :  { %s625_s7 = scalar_lea.vmem %s914_s20, 512  ;;  %p630_p11 = scmp.lt.s32.totalorder %s914_s20, %s914_s20 }
 0x103   :  { %p626_p10 = scmp.ne.s32.totalorder %s914_s20, %s625_s7  ;;  %p631_p12 = scmp.lt.s32.totalorder %s625_s7, %s625_s7 }
 0x105   :  { %p632_p13 = por %p631_p12, %p630_p11 }
 0x107   :  { %p633_p0 = pnand %p632_p13, %p626_p10 }
 0x109   :  { %636 = shalt.err (!%p633_p0)
}
 0x10a   :  { %s637_s10 = scalar_lea.hbm %s983_s2, 512 }
 0x10b   :  { %p638_p1 = scmp.ne.s32.totalorder %s983_s2, %s637_s10  ;;  %p641_p2 = scmp.lt.u32.totalorder %s637_s10, %s983_s2 }
 0x10d   :  { %p643_p3 = pnand %p641_p2, %p638_p1 }
 0x10f   :  { %646 = shalt.err (!%p643_p3)
}
 0x110   :  { %484 = dma.vmem_to_hbm [thread:$0]  %s914_s20, 512, %s983_s2, [#allocation5], %s678_s25, %s678_s25, %s679_s26   ;;  %vm254_vm2 = vcmp.eq.s32.totalorder %v847_v20, 2  ;;  %vm253_vm10 = vcmp.eq.s32.totalorder %v847_v20, 1  ;;  %vm252_vm11 = vcmp.eq.s32.totalorder %v847_v20, 0  ;;  %vm262_vm12 = vcmask 24576  }
 0x111   :  { %s688_s20 = smov [#allocation11]  }
 0x112   :  { %s502_s21 = sshll.u32 %s688_s20, 4  ;;  %s503_s21 = int_to_ptr.vmem [resolvable:$true] %s502_s21 }
 0x113   :  { %s647_s22 = scalar_lea.vmem %s503_s21, 32  ;;  %p652_p5 = scmp.lt.s32.totalorder %s503_s21, %s503_s21 }
 0x114   :  { %p648_p4 = scmp.ne.s32.totalorder %s503_s21, %s647_s22  ;;  %p653_p6 = scmp.lt.s32.totalorder %s647_s22, %s647_s22 }
 0x116   :  { %p654_p7 = por %p653_p6, %p652_p5 }
 0x118   :  { %p655_p8 = pnand %p654_p7, %p648_p4 }
 0x150   :  { %v204_v0 = vpop.xlane.xlu0 %203 }
 0x151   :  { %v205_v13 = vrot.slane %v204_v0, 4 }
 0x153   :  { %v206_v14 = vadd.f32 %v205_v13, %v204_v0 }
 0x155   :  { %v207_v15 = vrot.slane %v206_v14, 2 }
 0x157   :  { %v208_v39 = vadd.f32 %v207_v15, %v206_v14 }
 0x159   :  { %v209_v16 = vrot.slane %v208_v39, 1 }
 0x15b   :  { %v210_v17 = vadd.f32 %v209_v16, %v208_v39 }
 0x15d   :  { %530 = vpush %v210_v17 }
 0x160   :  { %v216_v18 = vpop.xlane.xlu1 %215 }
 0x161   :  { %v217_v19 = vrot.slane %v216_v18, 4 }
 0x163   :  { %v218_v21 = vadd.f32 %v217_v19, %v216_v18  ;;  %v230_v23 = vpop.xlane.xlu0 %229 }
 0x164   :  { %v231_v24 = vrot.slane %v230_v23, 4 }
 0x165   :  { %v219_v25 = vrot.slane %v218_v21, 2 }
 0x166   :  { %v232_v26 = vadd.f32 %v231_v24, %v230_v23 }
 0x167   :  { %v244_v22 = vpop.xlane.xlu0 %243  ;;  %v220_v27 = vadd.f32 %v219_v25, %v218_v21 }
 0x168   :  { %v233_v28 = vrot.slane %v232_v26, 2  ;;  %v245_v29 = vrot.slane %v244_v22, 4 }
 0x169   :  { %v221_v31 = vrot.slane %v220_v27, 1 }
 0x16a   :  { %v246_v32 = vadd.f32 %v245_v29, %v244_v22  ;;  %v234_v33 = vadd.f32 %v233_v28, %v232_v26 }
 0x16b   :  { %v222_v34 = vadd.f32 %v221_v31, %v220_v27 }
 0x16c   :  { %v247_v35 = vrot.slane %v246_v32, 2  ;;  %v235_v36 = vrot.slane %v234_v33, 1 }
 0x16d   :  { %532 = vpush %v222_v34 }
 0x16e   :  { %v236_v37 = vadd.f32 %v235_v36, %v234_v33  ;;  %v248_v38 = vadd.f32 %v247_v35, %v246_v32 }
 0x170   :  { %534 = vpush %v236_v37  ;;  %v249_v41 = vrot.slane %v248_v38, 1 }
 0x171   :  { %v416_v40 = vpop.xlane.xlu1 %415 }
 0x172   :  { %v417_v42 = vrot.slane %v416_v40, 4  ;;  %v250_v43 = vadd.f32 %v249_v41, %v248_v38 }
 0x174   :  { %v418_v44 = vadd.f32 %v417_v42, %v416_v40  ;;  %536 = vpush %v250_v43 }
 0x176   :  { %v419_v45 = vrot.slane %v418_v44, 2 }
 0x178   :  { %v420_v46 = vadd.f32 %v419_v45, %v418_v44 }
 0x17a   :  { %v421_v47 = vrot.slane %v420_v46, 1 }
 0x17c   :  { %v422_v48 = vadd.f32 %v421_v47, %v420_v46 }
 0x17e   :  { %538 = vpush %v422_v48  ;;  %v428_v4 = vpop.xlane.xlu0 %427 }
 0x17f   :  { %v429_v49 = vrot.slane %v428_v4, 4 }
 0x181   :  { %v430_v50 = vadd.f32 %v429_v49, %v428_v4 }
 0x182   :  { %v442_v51 = vpop.xlane.xlu1 %441 }
 0x183   :  { %v431_v52 = vrot.slane %v430_v50, 2  ;;  %v443_v6 = vrot.slane %v442_v51, 4 }
 0x185   :  { %v444_v1 = vadd.f32 %v443_v6, %v442_v51  ;;  %v432_v53 = vadd.f32 %v431_v52, %v430_v50 }
 0x186   :  { %v456_v30 = vpop.xlane.xlu0 %455 }
 0x187   :  { %v445_v54 = vrot.slane %v444_v1, 2  ;;  %v457_v5 = vrot.slane %v456_v30, 4  ;;  %v433_v55 = vrot.slane %v432_v53, 1 }
 0x189   :  { %v446_v56 = vadd.f32 %v445_v54, %v444_v1  ;;  %v458_v57 = vadd.f32 %v457_v5, %v456_v30  ;;  %v434_v3 = vadd.f32 %v433_v55, %v432_v53 }
 0x18b   :  { %v459_v58 = vrot.slane %v458_v57, 2  ;;  %540 = vpush %v434_v3  ;;  %v447_v59 = vrot.slane %v446_v56, 1 }
 0x18d   :  { %v460_v60 = vadd.f32 %v459_v58, %v458_v57  ;;  %v448_v2 = vadd.f32 %v447_v59, %v446_v56 }
 0x18e   :  { %s531_s2 = spop %530 }
 0x18f   :  { %542 = vpush %v448_v2  ;;  %v461_v61 = vrot.slane %v460_v60, 1  ;;  %v260_v10 = vstv %s531_s2 }
 0x191   :  { %v462_v62 = vadd.f32 %v461_v61, %v460_v60 }
 0x193   :  { %544 = vpush %v462_v62 }
 0x19e   :  { %s533_s25 = spop %532 }
 0x19f   :  { %v258_v8 = vstv %s533_s25 }
 0x1a1   :  { %s535_s26 = spop %534 }
 0x1a2   :  { %v255_v63 = vstv %s535_s26 }
 0x1a5   :  { %s537_s1 = spop %536 }
 0x1a6   :  { %v256_v9 = vstv %s537_s1 }
 0x1a7   :  { %v257_v7 = vsel %vm254_vm2, %v255_v63, %v256_v9 }
 0x1a8   :  { %v259_v11 = vsel %vm253_vm10, %v258_v8, %v257_v7 }
 0x1a9   :  { %v261_v12 = vsel %vm252_vm11, %v260_v10, %v259_v11 }
 0x1aa   :  { %263 = vst.msk [vmem:[#allocation11] sm:$0x1] %vm262_vm12, %v261_v12 }
 0x1af   :  { %s539_s16 = spop %538 }
 0x1b0   :  { %v469_v39 = vstv %s539_s16 }
 0x1bc   :  { %s541_s17 = spop %540 }
 0x1bd   :  { %v467_v14 = vstv %s541_s17 }
 0x1c0   :  { %s543_s18 = spop %542 }
 0x1c1   :  { %v464_v0 = vstv %s543_s18 }
 0x1c4   :  { %s545_s19 = spop %544 }
 0x1c5   :  { %v465_v13 = vstv %s545_s19 }
 0x1c6   :  { %v466_v15 = vsel %vm254_vm2, %v464_v0, %v465_v13 }
 0x1c7   :  { %v468_v16 = vsel %vm253_vm10, %v467_v14, %v466_v15 }
 0x1c8   :  { %v470_v17 = vsel %vm252_vm11, %v469_v39, %v468_v16 }
 0x1c9   :  { %472 = vst.msk [vmem:[#allocation11 + $0x1] sm:$0x1] %vm262_vm12, %v470_v17 }
 0x1ca   :  { %658 = shalt.err (!%p655_p8)
}
 0x1cb   :  { %s659_s27 = scalar_lea.hbm %s985_s4, 32 }
 0x1cc   :  { %p660_p9 = scmp.ne.s32.totalorder %s985_s4, %s659_s27  ;;  %p663_p10 = scmp.lt.u32.totalorder %s659_s27, %s985_s4 }
 0x1ce   :  { %p665_p11 = pnand %p663_p10, %p660_p9 }
 0x1d0   :  { %668 = shalt.err (!%p665_p11)
}
 0x1d1   :  { %s689_s6 = smov 16  }
 0x1d2   :  { %508 = dma.vmem_to_hbm [thread:$0]  %s503_s21, 32, %s985_s4, [#allocation10], %s689_s6, %s689_s6, %s682_s14  }
 0x1d3   :  { %673 = dma.done.wait [#allocation5], 512  }
 0x1d4   :  { %674 = vsyncadd [#allocation5], 4294966784 }
 0x1d5   :  { %675 = dma.done.wait [#allocation10], 544  }
 0x1d6   :  { %676 = vsyncadd [#allocation10], 4294966752 }
 0x1d7   :  { %518 = vsyncpa [#allocation4], 1 }
 0x1d8   :  { %519 = vsyncpa [#allocation7], 1 }
 0x1d9   :  { %520 = vsyncpa [#allocation5], 1 }
 0x1da   :  { %521 = vsyncpa [#allocation10], 1 }

</bundles_post_ra>
